<compile_context>
chip_gen: v7x
topology: tpu7x:2x2x1
jax: 0.10.0
libtpu: 0.0.40
codegen_flags: <defaults>
</compile_context>

<pallas_src>
import functools

import jax
import jax.numpy as jnp
from jax import lax
from jax.experimental import pallas as pl
from jax.experimental.pallas import tpu as pltpu


def _gru_layer(e_flat, h, wih_ref, whh_ref, bih_ref, bhh_ref, *, seq, batch):
    """One GRU layer over a time-major flattened sequence.

    e_flat : (seq*batch, emb) value (rows t*batch .. t*batch+batch-1 = step t)
    h      : (batch, hidden) value (carried hidden state)
    wih_ref: (3, emb, hidden)   whh_ref: (3, hidden, hidden)
    bih_ref: (3, 1, hidden)     bhh_ref: (3, 1, hidden)
    Gate order [r, z, n], matching PyTorch nn.GRU.
    """
    # --- Hoisted input projection: one big matmul per gate for the whole
    # sequence (M = seq*batch), removed from the serial recurrence. ---
    gi_r = jnp.dot(e_flat, wih_ref[0], preferred_element_type=jnp.float32) + bih_ref[0]
    gi_z = jnp.dot(e_flat, wih_ref[1], preferred_element_type=jnp.float32) + bih_ref[1]
    gi_n = jnp.dot(e_flat, wih_ref[2], preferred_element_type=jnp.float32) + bih_ref[2]

    # --- Loop-invariant loads hoisted out of the recurrence. ---
    whh_r = whh_ref[0]
    whh_z = whh_ref[1]
    whh_n = whh_ref[2]
    bhh_r = bhh_ref[0]
    bhh_z = bhh_ref[1]
    bhh_n = bhh_ref[2]

    # --- Recurrence, fully unrolled at trace time (seq is static). Per step:
    # three lane-aligned (batch, H) matmuls + EUP sigmoid/tanh + VPU blend. ---
    for t in range(seq):
        lo = t * batch
        xr = gi_r[lo:lo + batch, :]
        xz = gi_z[lo:lo + batch, :]
        xn = gi_n[lo:lo + batch, :]
        gh_r = jnp.dot(h, whh_r, preferred_element_type=jnp.float32) + bhh_r
        gh_z = jnp.dot(h, whh_z, preferred_element_type=jnp.float32) + bhh_z
        gh_n = jnp.dot(h, whh_n, preferred_element_type=jnp.float32) + bhh_n
        r = jax.nn.sigmoid(xr + gh_r)
        z = jax.nn.sigmoid(xz + gh_z)
        n = jnp.tanh(xn + r * gh_n)
        h = (1.0 - z) * n + z * h
    return h


def double_gru_kernel(e1_ref, e2_ref,
                      wih1_ref, whh1_ref, bih1_ref, bhh1_ref,
                      wih2_ref, whh2_ref, bih2_ref, bhh2_ref,
                      wlin_ref, blin_ref,
                      out_ref, *, seq1, seq2, batch, hidden):
    # h0 = zeros (init_hidden); hidden state carried as a value (no scratch).
    h = jnp.zeros((batch, hidden), jnp.float32)

    h = _gru_layer(e1_ref[...], h, wih1_ref, whh1_ref, bih1_ref, bhh1_ref,
                   seq=seq1, batch=batch)
    h = _gru_layer(e2_ref[...], h, wih2_ref, whh2_ref, bih2_ref, bhh2_ref,
                   seq=seq2, batch=batch)

    # gru2_out[-1] == final hidden (num_layers == 1) -> Linear -> log_softmax
    lin = jnp.dot(h, wlin_ref[...], preferred_element_type=jnp.float32) + blin_ref[...]
    m = jnp.max(lin, axis=1, keepdims=True)
    shifted = lin - m
    lse = jnp.log(jnp.sum(jnp.exp(shifted), axis=1, keepdims=True))
    out_ref[...] = shifted - lse


def double_gru_forward(input1, input2, params):
    """input1/input2: (batch, seq) int32 token ids. Returns (batch, output) log-probs."""
    emb_table = params["embedding"]
    batch, seq1 = input1.shape
    _, seq2 = input2.shape
    emb = emb_table.shape[1]
    hidden = params["whh1"].shape[-1]
    out_size = params["wlin"].shape[1]

    # embedding(input).transpose(0, 1) -> (seq, batch, emb), flattened time-major
    # to (seq*batch, emb) so the whole-sequence input projection is one matmul
    # and per-step access inside the kernel is a static row slice.
    e1 = jnp.take(emb_table, input1, axis=0).transpose(1, 0, 2).reshape(seq1 * batch, emb)
    e2 = jnp.take(emb_table, input2, axis=0).transpose(1, 0, 2).reshape(seq2 * batch, emb)

    args = (e1, e2,
            params["wih1"], params["whh1"], params["bih1"], params["bhh1"],
            params["wih2"], params["whh2"], params["bih2"], params["bhh2"],
            params["wlin"], params["blin"])

    vmem = pl.BlockSpec(memory_space=pltpu.MemorySpace.VMEM)
    kernel = functools.partial(double_gru_kernel, seq1=seq1, seq2=seq2,
                               batch=batch, hidden=hidden)
    return pl.pallas_call(
        kernel,
        out_shape=jax.ShapeDtypeStruct((batch, out_size), jnp.float32),
        in_specs=[vmem] * len(args),
        out_specs=vmem,
        compiler_params=pltpu.CompilerParams(vmem_limit_bytes=32 * 1024 * 1024),
    )(*args)


def init_params(key, vocab_size, embedding_size, hidden_size, output_size):
    """Parameter init mirroring the PyTorch module's shapes.

    GRU weights are stored per-gate (stacked leading axis of 3, order [r,z,n])
    and pre-transposed for x @ W, so gate math in the kernel never slices
    inside a 128-lane vreg.
    """
    ks = jax.random.split(key, 12)
    kg = 1.0 / float(hidden_size) ** 0.5   # GRU & Linear init scale

    def u(kk, shape, scale):
        return jax.random.uniform(kk, shape, jnp.float32, -scale, scale)

    return {
        # nn.Embedding(vocab, emb): N(0, 1)
        "embedding": jax.random.normal(ks[0], (vocab_size, embedding_size), jnp.float32),
        # nn.GRU(emb, hidden) #1
        "wih1": u(ks[1], (3, embedding_size, hidden_size), kg),
        "whh1": u(ks[2], (3, hidden_size, hidden_size), kg),
        "bih1": u(ks[3], (3, 1, hidden_size), kg),
        "bhh1": u(ks[4], (3, 1, hidden_size), kg),
        # nn.GRU(emb, hidden) #2
        "wih2": u(ks[5], (3, embedding_size, hidden_size), kg),
        "whh2": u(ks[6], (3, hidden_size, hidden_size), kg),
        "bih2": u(ks[7], (3, 1, hidden_size), kg),
        "bhh2": u(ks[8], (3, 1, hidden_size), kg),
        # nn.Linear(hidden, output)
        "wlin": u(ks[9], (hidden_size, output_size), kg),
        "blin": u(ks[10], (1, output_size), kg),
    }


def reference_forward(input1, input2, p):
    """Pure-JAX reference replicating the PyTorch forward pass."""
    batch = input1.shape[0]
    hidden = p["whh1"].shape[-1]
    e1 = jnp.take(p["embedding"], input1, axis=0).transpose(1, 0, 2)
    e2 = jnp.take(p["embedding"], input2, axis=0).transpose(1, 0, 2)

    def gru(e, h, wih, whh, bih, bhh):
        def step(h, x):
            r = jax.nn.sigmoid(x @ wih[0] + bih[0] + h @ whh[0] + bhh[0])
            z = jax.nn.sigmoid(x @ wih[1] + bih[1] + h @ whh[1] + bhh[1])
            n = jnp.tanh(x @ wih[2] + bih[2] + r * (h @ whh[2] + bhh[2]))
            return (1.0 - z) * n + z * h, None
        h, _ = lax.scan(step, h, e)
        return h

    h = jnp.zeros((batch, hidden), jnp.float32)
    h = gru(e1, h, p["wih1"], p["whh1"], p["bih1"], p["bhh1"])
    h = gru(e2, h, p["wih2"], p["whh2"], p["bih2"], p["bhh2"])
    lin = h @ p["wlin"] + p["blin"][0]
    return jax.nn.log_softmax(lin, axis=1)


if __name__ == "__main__":
    vocab_size, embedding_size, hidden_size, output_size = 32, 16, 32, 16
    batch, seq1, seq2 = 4, 8, 8

    key = jax.random.PRNGKey(0)
    kp, k1, k2 = jax.random.split(key, 3)
    params = init_params(kp, vocab_size, embedding_size, hidden_size, output_size)
    input1 = jax.random.randint(k1, (batch, seq1), 0, vocab_size, dtype=jnp.int32)
    input2 = jax.random.randint(k2, (batch, seq2), 0, vocab_size, dtype=jnp.int32)

    logits = double_gru_forward(input1, input2, params)
    jax.block_until_ready(logits)

    ref = reference_forward(input1, input2, params)
    assert logits.shape == (batch, output_size)
    assert jnp.allclose(logits, ref, atol=1e-5, rtol=1e-5), "mismatch vs reference"

    print("KERNEL_OK")
</pallas_src>

<mosaic_0001>
module attributes {stable_mosaic.version = 11 : i64} {
  func.func @double_gru_kernel(%arg0: memref<32x16xf32, #tpu.memory_space<vmem>>, %arg1: memref<32x16xf32, #tpu.memory_space<vmem>>, %arg2: memref<3x16x32xf32, #tpu.memory_space<vmem>>, %arg3: memref<3x32x32xf32, #tpu.memory_space<vmem>>, %arg4: memref<3x1x32xf32, #tpu.memory_space<vmem>>, %arg5: memref<3x1x32xf32, #tpu.memory_space<vmem>>, %arg6: memref<3x16x32xf32, #tpu.memory_space<vmem>>, %arg7: memref<3x32x32xf32, #tpu.memory_space<vmem>>, %arg8: memref<3x1x32xf32, #tpu.memory_space<vmem>>, %arg9: memref<3x1x32xf32, #tpu.memory_space<vmem>>, %arg10: memref<32x16xf32, #tpu.memory_space<vmem>>, %arg11: memref<1x16xf32, #tpu.memory_space<vmem>>, %arg12: memref<4x16xf32, #tpu.memory_space<vmem>>) attributes {dimension_semantics = [], scalar_prefetch = 0 : i64, scratch_operands = 0 : i64, tpu.core_type = #tpu.core_type<tc>} {
    %cst = arith.constant 0.000000e+00 : f32
    %0 = vector.broadcast %cst : f32 to vector<4x32xf32>
    %c0 = arith.constant 0 : index
    %c0_0 = arith.constant 0 : index
    %1 = vector.load %arg0[%c0, %c0_0] : memref<32x16xf32, #tpu.memory_space<vmem>>, vector<32x16xf32>
    %c0_1 = arith.constant 0 : index
    %c0_2 = arith.constant 0 : index
    %c0_3 = arith.constant 0 : index
    %2 = vector.load %arg2[%c0_1, %c0_2, %c0_3] : memref<3x16x32xf32, #tpu.memory_space<vmem>>, vector<1x16x32xf32>
    %3 = vector.shape_cast %2 : vector<1x16x32xf32> to vector<16x32xf32>
    %cst_4 = arith.constant dense<0.000000e+00> : vector<32x32xf32>
    %4 = tpu.matmul %1, %3, %cst_4 {dimension_numbers = #tpu.dot_dimension_numbers<[1], [0], [0], [1], [0, 0, 1, 1], [], []>} : vector<32x16xf32>, vector<16x32xf32>, vector<32x32xf32> -> vector<32x32xf32>
    %c0_5 = arith.constant 0 : index
    %c0_6 = arith.constant 0 : index
    %c0_7 = arith.constant 0 : index
    %5 = vector.load %arg4[%c0_5, %c0_6, %c0_7] : memref<3x1x32xf32, #tpu.memory_space<vmem>>, vector<1x1x32xf32>
    %6 = vector.shape_cast %5 : vector<1x1x32xf32> to vector<1x32xf32>
    %7 = vector.broadcast %6 : vector<1x32xf32> to vector<32x32xf32>
    %8 = arith.addf %4, %7 : vector<32x32xf32>
    %c1 = arith.constant 1 : index
    %c0_8 = arith.constant 0 : index
    %c0_9 = arith.constant 0 : index
    %9 = vector.load %arg2[%c1, %c0_8, %c0_9] : memref<3x16x32xf32, #tpu.memory_space<vmem>>, vector<1x16x32xf32>
    %10 = vector.shape_cast %9 : vector<1x16x32xf32> to vector<16x32xf32>
    %cst_10 = arith.constant dense<0.000000e+00> : vector<32x32xf32>
    %11 = tpu.matmul %1, %10, %cst_10 {dimension_numbers = #tpu.dot_dimension_numbers<[1], [0], [0], [1], [0, 0, 1, 1], [], []>} : vector<32x16xf32>, vector<16x32xf32>, vector<32x32xf32> -> vector<32x32xf32>
    %c1_11 = arith.constant 1 : index
    %c0_12 = arith.constant 0 : index
    %c0_13 = arith.constant 0 : index
    %12 = vector.load %arg4[%c1_11, %c0_12, %c0_13] : memref<3x1x32xf32, #tpu.memory_space<vmem>>, vector<1x1x32xf32>
    %13 = vector.shape_cast %12 : vector<1x1x32xf32> to vector<1x32xf32>
    %14 = vector.broadcast %13 : vector<1x32xf32> to vector<32x32xf32>
    %15 = arith.addf %11, %14 : vector<32x32xf32>
    %c2 = arith.constant 2 : index
    %c0_14 = arith.constant 0 : index
    %c0_15 = arith.constant 0 : index
    %16 = vector.load %arg2[%c2, %c0_14, %c0_15] : memref<3x16x32xf32, #tpu.memory_space<vmem>>, vector<1x16x32xf32>
    %17 = vector.shape_cast %16 : vector<1x16x32xf32> to vector<16x32xf32>
    %cst_16 = arith.constant dense<0.000000e+00> : vector<32x32xf32>
    %18 = tpu.matmul %1, %17, %cst_16 {dimension_numbers = #tpu.dot_dimension_numbers<[1], [0], [0], [1], [0, 0, 1, 1], [], []>} : vector<32x16xf32>, vector<16x32xf32>, vector<32x32xf32> -> vector<32x32xf32>
    %c2_17 = arith.constant 2 : index
    %c0_18 = arith.constant 0 : index
    %c0_19 = arith.constant 0 : index
    %19 = vector.load %arg4[%c2_17, %c0_18, %c0_19] : memref<3x1x32xf32, #tpu.memory_space<vmem>>, vector<1x1x32xf32>
    %20 = vector.shape_cast %19 : vector<1x1x32xf32> to vector<1x32xf32>
    %21 = vector.broadcast %20 : vector<1x32xf32> to vector<32x32xf32>
    %22 = arith.addf %18, %21 : vector<32x32xf32>
    %c0_20 = arith.constant 0 : index
    %c0_21 = arith.constant 0 : index
    %c0_22 = arith.constant 0 : index
    %23 = vector.load %arg3[%c0_20, %c0_21, %c0_22] : memref<3x32x32xf32, #tpu.memory_space<vmem>>, vector<1x32x32xf32>
    %24 = vector.shape_cast %23 : vector<1x32x32xf32> to vector<32x32xf32>
    %c1_23 = arith.constant 1 : index
    %c0_24 = arith.constant 0 : index
    %c0_25 = arith.constant 0 : index
    %25 = vector.load %arg3[%c1_23, %c0_24, %c0_25] : memref<3x32x32xf32, #tpu.memory_space<vmem>>, vector<1x32x32xf32>
    %26 = vector.shape_cast %25 : vector<1x32x32xf32> to vector<32x32xf32>
    %c2_26 = arith.constant 2 : index
    %c0_27 = arith.constant 0 : index
    %c0_28 = arith.constant 0 : index
    %27 = vector.load %arg3[%c2_26, %c0_27, %c0_28] : memref<3x32x32xf32, #tpu.memory_space<vmem>>, vector<1x32x32xf32>
    %28 = vector.shape_cast %27 : vector<1x32x32xf32> to vector<32x32xf32>
    %c0_29 = arith.constant 0 : index
    %c0_30 = arith.constant 0 : index
    %c0_31 = arith.constant 0 : index
    %29 = vector.load %arg5[%c0_29, %c0_30, %c0_31] : memref<3x1x32xf32, #tpu.memory_space<vmem>>, vector<1x1x32xf32>
    %30 = vector.shape_cast %29 : vector<1x1x32xf32> to vector<1x32xf32>
    %c1_32 = arith.constant 1 : index
    %c0_33 = arith.constant 0 : index
    %c0_34 = arith.constant 0 : index
    %31 = vector.load %arg5[%c1_32, %c0_33, %c0_34] : memref<3x1x32xf32, #tpu.memory_space<vmem>>, vector<1x1x32xf32>
    %32 = vector.shape_cast %31 : vector<1x1x32xf32> to vector<1x32xf32>
    %c2_35 = arith.constant 2 : index
    %c0_36 = arith.constant 0 : index
    %c0_37 = arith.constant 0 : index
    %33 = vector.load %arg5[%c2_35, %c0_36, %c0_37] : memref<3x1x32xf32, #tpu.memory_space<vmem>>, vector<1x1x32xf32>
    %34 = vector.shape_cast %33 : vector<1x1x32xf32> to vector<1x32xf32>
    %35 = vector.extract_strided_slice %8 {offsets = [0, 0], sizes = [4, 32], strides = [1, 1]} : vector<32x32xf32> to vector<4x32xf32>
    %36 = vector.extract_strided_slice %15 {offsets = [0, 0], sizes = [4, 32], strides = [1, 1]} : vector<32x32xf32> to vector<4x32xf32>
    %37 = vector.extract_strided_slice %22 {offsets = [0, 0], sizes = [4, 32], strides = [1, 1]} : vector<32x32xf32> to vector<4x32xf32>
    %cst_38 = arith.constant dense<0.000000e+00> : vector<4x32xf32>
    %38 = tpu.matmul %0, %24, %cst_38 {dimension_numbers = #tpu.dot_dimension_numbers<[1], [0], [0], [1], [0, 0, 1, 1], [], []>} : vector<4x32xf32>, vector<32x32xf32>, vector<4x32xf32> -> vector<4x32xf32>
    %39 = vector.broadcast %30 : vector<1x32xf32> to vector<4x32xf32>
    %40 = arith.addf %38, %39 : vector<4x32xf32>
    %cst_39 = arith.constant dense<0.000000e+00> : vector<4x32xf32>
    %41 = tpu.matmul %0, %26, %cst_39 {dimension_numbers = #tpu.dot_dimension_numbers<[1], [0], [0], [1], [0, 0, 1, 1], [], []>} : vector<4x32xf32>, vector<32x32xf32>, vector<4x32xf32> -> vector<4x32xf32>
    %42 = vector.broadcast %32 : vector<1x32xf32> to vector<4x32xf32>
    %43 = arith.addf %41, %42 : vector<4x32xf32>
    %cst_40 = arith.constant dense<0.000000e+00> : vector<4x32xf32>
    %44 = tpu.matmul %0, %28, %cst_40 {dimension_numbers = #tpu.dot_dimension_numbers<[1], [0], [0], [1], [0, 0, 1, 1], [], []>} : vector<4x32xf32>, vector<32x32xf32>, vector<4x32xf32> -> vector<4x32xf32>
    %45 = vector.broadcast %34 : vector<1x32xf32> to vector<4x32xf32>
    %46 = arith.addf %44, %45 : vector<4x32xf32>
    %47 = arith.addf %35, %40 : vector<4x32xf32>
    %48 = arith.negf %47 : vector<4x32xf32>
    %49 = math.exp %48 : vector<4x32xf32>
    %cst_41 = arith.constant 1.000000e+00 : f32
    %50 = vector.broadcast %cst_41 : f32 to vector<4x32xf32>
    %51 = arith.addf %50, %49 : vector<4x32xf32>
    %52 = arith.divf %50, %51 : vector<4x32xf32>
    %53 = arith.addf %36, %43 : vector<4x32xf32>
    %54 = arith.negf %53 : vector<4x32xf32>
    %55 = math.exp %54 : vector<4x32xf32>
    %cst_42 = arith.constant 1.000000e+00 : f32
    %56 = vector.broadcast %cst_42 : f32 to vector<4x32xf32>
    %57 = arith.addf %56, %55 : vector<4x32xf32>
    %58 = arith.divf %56, %57 : vector<4x32xf32>
    %59 = arith.mulf %52, %46 : vector<4x32xf32>
    %60 = arith.addf %37, %59 : vector<4x32xf32>
    %61 = math.tanh %60 : vector<4x32xf32>
    %cst_43 = arith.constant 1.000000e+00 : f32
    %62 = vector.broadcast %cst_43 : f32 to vector<4x32xf32>
    %63 = arith.subf %62, %58 : vector<4x32xf32>
    %64 = arith.mulf %63, %61 : vector<4x32xf32>
    %65 = arith.mulf %58, %0 : vector<4x32xf32>
    %66 = arith.addf %64, %65 : vector<4x32xf32>
    %67 = vector.extract_strided_slice %8 {offsets = [4, 0], sizes = [4, 32], strides = [1, 1]} : vector<32x32xf32> to vector<4x32xf32>
    %68 = vector.extract_strided_slice %15 {offsets = [4, 0], sizes = [4, 32], strides = [1, 1]} : vector<32x32xf32> to vector<4x32xf32>
    %69 = vector.extract_strided_slice %22 {offsets = [4, 0], sizes = [4, 32], strides = [1, 1]} : vector<32x32xf32> to vector<4x32xf32>
    %cst_44 = arith.constant dense<0.000000e+00> : vector<4x32xf32>
    %70 = tpu.matmul %66, %24, %cst_44 {dimension_numbers = #tpu.dot_dimension_numbers<[1], [0], [0], [1], [0, 0, 1, 1], [], []>} : vector<4x32xf32>, vector<32x32xf32>, vector<4x32xf32> -> vector<4x32xf32>
    %71 = vector.broadcast %30 : vector<1x32xf32> to vector<4x32xf32>
    %72 = arith.addf %70, %71 : vector<4x32xf32>
    %cst_45 = arith.constant dense<0.000000e+00> : vector<4x32xf32>
    %73 = tpu.matmul %66, %26, %cst_45 {dimension_numbers = #tpu.dot_dimension_numbers<[1], [0], [0], [1], [0, 0, 1, 1], [], []>} : vector<4x32xf32>, vector<32x32xf32>, vector<4x32xf32> -> vector<4x32xf32>
    %74 = vector.broadcast %32 : vector<1x32xf32> to vector<4x32xf32>
    %75 = arith.addf %73, %74 : vector<4x32xf32>
    %cst_46 = arith.constant dense<0.000000e+00> : vector<4x32xf32>
    %76 = tpu.matmul %66, %28, %cst_46 {dimension_numbers = #tpu.dot_dimension_numbers<[1], [0], [0], [1], [0, 0, 1, 1], [], []>} : vector<4x32xf32>, vector<32x32xf32>, vector<4x32xf32> -> vector<4x32xf32>
    %77 = vector.broadcast %34 : vector<1x32xf32> to vector<4x32xf32>
    %78 = arith.addf %76, %77 : vector<4x32xf32>
    %79 = arith.addf %67, %72 : vector<4x32xf32>
    %80 = arith.negf %79 : vector<4x32xf32>
    %81 = math.exp %80 : vector<4x32xf32>
    %cst_47 = arith.constant 1.000000e+00 : f32
    %82 = vector.broadcast %cst_47 : f32 to vector<4x32xf32>
    %83 = arith.addf %82, %81 : vector<4x32xf32>
    %84 = arith.divf %82, %83 : vector<4x32xf32>
    %85 = arith.addf %68, %75 : vector<4x32xf32>
    %86 = arith.negf %85 : vector<4x32xf32>
    %87 = math.exp %86 : vector<4x32xf32>
    %cst_48 = arith.constant 1.000000e+00 : f32
    %88 = vector.broadcast %cst_48 : f32 to vector<4x32xf32>
    %89 = arith.addf %88, %87 : vector<4x32xf32>
    %90 = arith.divf %88, %89 : vector<4x32xf32>
    %91 = arith.mulf %84, %78 : vector<4x32xf32>
    %92 = arith.addf %69, %91 : vector<4x32xf32>
    %93 = math.tanh %92 : vector<4x32xf32>
    %cst_49 = arith.constant 1.000000e+00 : f32
    %94 = vector.broadcast %cst_49 : f32 to vector<4x32xf32>
    %95 = arith.subf %94, %90 : vector<4x32xf32>
    %96 = arith.mulf %95, %93 : vector<4x32xf32>
    %97 = arith.mulf %90, %66 : vector<4x32xf32>
    %98 = arith.addf %96, %97 : vector<4x32xf32>
    %99 = vector.extract_strided_slice %8 {offsets = [8, 0], sizes = [4, 32], strides = [1, 1]} : vector<32x32xf32> to vector<4x32xf32>
    %100 = vector.extract_strided_slice %15 {offsets = [8, 0], sizes = [4, 32], strides = [1, 1]} : vector<32x32xf32> to vector<4x32xf32>
    %101 = vector.extract_strided_slice %22 {offsets = [8, 0], sizes = [4, 32], strides = [1, 1]} : vector<32x32xf32> to vector<4x32xf32>
    %cst_50 = arith.constant dense<0.000000e+00> : vector<4x32xf32>
    %102 = tpu.matmul %98, %24, %cst_50 {dimension_numbers = #tpu.dot_dimension_numbers<[1], [0], [0], [1], [0, 0, 1, 1], [], []>} : vector<4x32xf32>, vector<32x32xf32>, vector<4x32xf32> -> vector<4x32xf32>
    %103 = vector.broadcast %30 : vector<1x32xf32> to vector<4x32xf32>
    %104 = arith.addf %102, %103 : vector<4x32xf32>
    %cst_51 = arith.constant dense<0.000000e+00> : vector<4x32xf32>
    %105 = tpu.matmul %98, %26, %cst_51 {dimension_numbers = #tpu.dot_dimension_numbers<[1], [0], [0], [1], [0, 0, 1, 1], [], []>} : vector<4x32xf32>, vector<32x32xf32>, vector<4x32xf32> -> vector<4x32xf32>
    %106 = vector.broadcast %32 : vector<1x32xf32> to vector<4x32xf32>
    %107 = arith.addf %105, %106 : vector<4x32xf32>
    %cst_52 = arith.constant dense<0.000000e+00> : vector<4x32xf32>
    %108 = tpu.matmul %98, %28, %cst_52 {dimension_numbers = #tpu.dot_dimension_numbers<[1], [0], [0], [1], [0, 0, 1, 1], [], []>} : vector<4x32xf32>, vector<32x32xf32>, vector<4x32xf32> -> vector<4x32xf32>
    %109 = vector.broadcast %34 : vector<1x32xf32> to vector<4x32xf32>
    %110 = arith.addf %108, %109 : vector<4x32xf32>
    %111 = arith.addf %99, %104 : vector<4x32xf32>
    %112 = arith.negf %111 : vector<4x32xf32>
    %113 = math.exp %112 : vector<4x32xf32>
    %cst_53 = arith.constant 1.000000e+00 : f32
    %114 = vector.broadcast %cst_53 : f32 to vector<4x32xf32>
    %115 = arith.addf %114, %113 : vector<4x32xf32>
    %116 = arith.divf %114, %115 : vector<4x32xf32>
    %117 = arith.addf %100, %107 : vector<4x32xf32>
    %118 = arith.negf %117 : vector<4x32xf32>
    %119 = math.exp %118 : vector<4x32xf32>
    %cst_54 = arith.constant 1.000000e+00 : f32
    %120 = vector.broadcast %cst_54 : f32 to vector<4x32xf32>
    %121 = arith.addf %120, %119 : vector<4x32xf32>
    %122 = arith.divf %120, %121 : vector<4x32xf32>
    %123 = arith.mulf %116, %110 : vector<4x32xf32>
    %124 = arith.addf %101, %123 : vector<4x32xf32>
    %125 = math.tanh %124 : vector<4x32xf32>
    %cst_55 = arith.constant 1.000000e+00 : f32
    %126 = vector.broadcast %cst_55 : f32 to vector<4x32xf32>
    %127 = arith.subf %126, %122 : vector<4x32xf32>
    %128 = arith.mulf %127, %125 : vector<4x32xf32>
    %129 = arith.mulf %122, %98 : vector<4x32xf32>
    %130 = arith.addf %128, %129 : vector<4x32xf32>
    %131 = vector.extract_strided_slice %8 {offsets = [12, 0], sizes = [4, 32], strides = [1, 1]} : vector<32x32xf32> to vector<4x32xf32>
    %132 = vector.extract_strided_slice %15 {offsets = [12, 0], sizes = [4, 32], strides = [1, 1]} : vector<32x32xf32> to vector<4x32xf32>
    %133 = vector.extract_strided_slice %22 {offsets = [12, 0], sizes = [4, 32], strides = [1, 1]} : vector<32x32xf32> to vector<4x32xf32>
    %cst_56 = arith.constant dense<0.000000e+00> : vector<4x32xf32>
    %134 = tpu.matmul %130, %24, %cst_56 {dimension_numbers = #tpu.dot_dimension_numbers<[1], [0], [0], [1], [0, 0, 1, 1], [], []>} : vector<4x32xf32>, vector<32x32xf32>, vector<4x32xf32> -> vector<4x32xf32>
    %135 = vector.broadcast %30 : vector<1x32xf32> to vector<4x32xf32>
    %136 = arith.addf %134, %135 : vector<4x32xf32>
    %cst_57 = arith.constant dense<0.000000e+00> : vector<4x32xf32>
    %137 = tpu.matmul %130, %26, %cst_57 {dimension_numbers = #tpu.dot_dimension_numbers<[1], [0], [0], [1], [0, 0, 1, 1], [], []>} : vector<4x32xf32>, vector<32x32xf32>, vector<4x32xf32> -> vector<4x32xf32>
    %138 = vector.broadcast %32 : vector<1x32xf32> to vector<4x32xf32>
    %139 = arith.addf %137, %138 : vector<4x32xf32>
    %cst_58 = arith.constant dense<0.000000e+00> : vector<4x32xf32>
    %140 = tpu.matmul %130, %28, %cst_58 {dimension_numbers = #tpu.dot_dimension_numbers<[1], [0], [0], [1], [0, 0, 1, 1], [], []>} : vector<4x32xf32>, vector<32x32xf32>, vector<4x32xf32> -> vector<4x32xf32>
    %141 = vector.broadcast %34 : vector<1x32xf32> to vector<4x32xf32>
    %142 = arith.addf %140, %141 : vector<4x32xf32>
    %143 = arith.addf %131, %136 : vector<4x32xf32>
    %144 = arith.negf %143 : vector<4x32xf32>
    %145 = math.exp %144 : vector<4x32xf32>
    %cst_59 = arith.constant 1.000000e+00 : f32
    %146 = vector.broadcast %cst_59 : f32 to vector<4x32xf32>
    %147 = arith.addf %146, %145 : vector<4x32xf32>
    %148 = arith.divf %146, %147 : vector<4x32xf32>
    %149 = arith.addf %132, %139 : vector<4x32xf32>
    %150 = arith.negf %149 : vector<4x32xf32>
    %151 = math.exp %150 : vector<4x32xf32>
    %cst_60 = arith.constant 1.000000e+00 : f32
    %152 = vector.broadcast %cst_60 : f32 to vector<4x32xf32>
    %153 = arith.addf %152, %151 : vector<4x32xf32>
    %154 = arith.divf %152, %153 : vector<4x32xf32>
    %155 = arith.mulf %148, %142 : vector<4x32xf32>
    %156 = arith.addf %133, %155 : vector<4x32xf32>
    %157 = math.tanh %156 : vector<4x32xf32>
    %cst_61 = arith.constant 1.000000e+00 : f32
    %158 = vector.broadcast %cst_61 : f32 to vector<4x32xf32>
    %159 = arith.subf %158, %154 : vector<4x32xf32>
    %160 = arith.mulf %159, %157 : vector<4x32xf32>
    %161 = arith.mulf %154, %130 : vector<4x32xf32>
    %162 = arith.addf %160, %161 : vector<4x32xf32>
    %163 = vector.extract_strided_slice %8 {offsets = [16, 0], sizes = [4, 32], strides = [1, 1]} : vector<32x32xf32> to vector<4x32xf32>
    %164 = vector.extract_strided_slice %15 {offsets = [16, 0], sizes = [4, 32], strides = [1, 1]} : vector<32x32xf32> to vector<4x32xf32>
    %165 = vector.extract_strided_slice %22 {offsets = [16, 0], sizes = [4, 32], strides = [1, 1]} : vector<32x32xf32> to vector<4x32xf32>
    %cst_62 = arith.constant dense<0.000000e+00> : vector<4x32xf32>
    %166 = tpu.matmul %162, %24, %cst_62 {dimension_numbers = #tpu.dot_dimension_numbers<[1], [0], [0], [1], [0, 0, 1, 1], [], []>} : vector<4x32xf32>, vector<32x32xf32>, vector<4x32xf32> -> vector<4x32xf32>
    %167 = vector.broadcast %30 : vector<1x32xf32> to vector<4x32xf32>
    %168 = arith.addf %166, %167 : vector<4x32xf32>
    %cst_63 = arith.constant dense<0.000000e+00> : vector<4x32xf32>
    %169 = tpu.matmul %162, %26, %cst_63 {dimension_numbers = #tpu.dot_dimension_numbers<[1], [0], [0], [1], [0, 0, 1, 1], [], []>} : vector<4x32xf32>, vector<32x32xf32>, vector<4x32xf32> -> vector<4x32xf32>
    %170 = vector.broadcast %32 : vector<1x32xf32> to vector<4x32xf32>
    %171 = arith.addf %169, %170 : vector<4x32xf32>
    %cst_64 = arith.constant dense<0.000000e+00> : vector<4x32xf32>
    %172 = tpu.matmul %162, %28, %cst_64 {dimension_numbers = #tpu.dot_dimension_numbers<[1], [0], [0], [1], [0, 0, 1, 1], [], []>} : vector<4x32xf32>, vector<32x32xf32>, vector<4x32xf32> -> vector<4x32xf32>
    %173 = vector.broadcast %34 : vector<1x32xf32> to vector<4x32xf32>
    %174 = arith.addf %172, %173 : vector<4x32xf32>
    %175 = arith.addf %163, %168 : vector<4x32xf32>
    %176 = arith.negf %175 : vector<4x32xf32>
    %177 = math.exp %176 : vector<4x32xf32>
    %cst_65 = arith.constant 1.000000e+00 : f32
    %178 = vector.broadcast %cst_65 : f32 to vector<4x32xf32>
    %179 = arith.addf %178, %177 : vector<4x32xf32>
    %180 = arith.divf %178, %179 : vector<4x32xf32>
    %181 = arith.addf %164, %171 : vector<4x32xf32>
    %182 = arith.negf %181 : vector<4x32xf32>
    %183 = math.exp %182 : vector<4x32xf32>
    %cst_66 = arith.constant 1.000000e+00 : f32
    %184 = vector.broadcast %cst_66 : f32 to vector<4x32xf32>
    %185 = arith.addf %184, %183 : vector<4x32xf32>
    %186 = arith.divf %184, %185 : vector<4x32xf32>
    %187 = arith.mulf %180, %174 : vector<4x32xf32>
    %188 = arith.addf %165, %187 : vector<4x32xf32>
    %189 = math.tanh %188 : vector<4x32xf32>
    %cst_67 = arith.constant 1.000000e+00 : f32
    %190 = vector.broadcast %cst_67 : f32 to vector<4x32xf32>
    %191 = arith.subf %190, %186 : vector<4x32xf32>
    %192 = arith.mulf %191, %189 : vector<4x32xf32>
    %193 = arith.mulf %186, %162 : vector<4x32xf32>
    %194 = arith.addf %192, %193 : vector<4x32xf32>
    %195 = vector.extract_strided_slice %8 {offsets = [20, 0], sizes = [4, 32], strides = [1, 1]} : vector<32x32xf32> to vector<4x32xf32>
    %196 = vector.extract_strided_slice %15 {offsets = [20, 0], sizes = [4, 32], strides = [1, 1]} : vector<32x32xf32> to vector<4x32xf32>
    %197 = vector.extract_strided_slice %22 {offsets = [20, 0], sizes = [4, 32], strides = [1, 1]} : vector<32x32xf32> to vector<4x32xf32>
    %cst_68 = arith.constant dense<0.000000e+00> : vector<4x32xf32>
    %198 = tpu.matmul %194, %24, %cst_68 {dimension_numbers = #tpu.dot_dimension_numbers<[1], [0], [0], [1], [0, 0, 1, 1], [], []>} : vector<4x32xf32>, vector<32x32xf32>, vector<4x32xf32> -> vector<4x32xf32>
    %199 = vector.broadcast %30 : vector<1x32xf32> to vector<4x32xf32>
    %200 = arith.addf %198, %199 : vector<4x32xf32>
    %cst_69 = arith.constant dense<0.000000e+00> : vector<4x32xf32>
    %201 = tpu.matmul %194, %26, %cst_69 {dimension_numbers = #tpu.dot_dimension_numbers<[1], [0], [0], [1], [0, 0, 1, 1], [], []>} : vector<4x32xf32>, vector<32x32xf32>, vector<4x32xf32> -> vector<4x32xf32>
    %202 = vector.broadcast %32 : vector<1x32xf32> to vector<4x32xf32>
    %203 = arith.addf %201, %202 : vector<4x32xf32>
    %cst_70 = arith.constant dense<0.000000e+00> : vector<4x32xf32>
    %204 = tpu.matmul %194, %28, %cst_70 {dimension_numbers = #tpu.dot_dimension_numbers<[1], [0], [0], [1], [0, 0, 1, 1], [], []>} : vector<4x32xf32>, vector<32x32xf32>, vector<4x32xf32> -> vector<4x32xf32>
    %205 = vector.broadcast %34 : vector<1x32xf32> to vector<4x32xf32>
    %206 = arith.addf %204, %205 : vector<4x32xf32>
    %207 = arith.addf %195, %200 : vector<4x32xf32>
    %208 = arith.negf %207 : vector<4x32xf32>
    %209 = math.exp %208 : vector<4x32xf32>
    %cst_71 = arith.constant 1.000000e+00 : f32
    %210 = vector.broadcast %cst_71 : f32 to vector<4x32xf32>
    %211 = arith.addf %210, %209 : vector<4x32xf32>
    %212 = arith.divf %210, %211 : vector<4x32xf32>
    %213 = arith.addf %196, %203 : vector<4x32xf32>
    %214 = arith.negf %213 : vector<4x32xf32>
    %215 = math.exp %214 : vector<4x32xf32>
    %cst_72 = arith.constant 1.000000e+00 : f32
    %216 = vector.broadcast %cst_72 : f32 to vector<4x32xf32>
    %217 = arith.addf %216, %215 : vector<4x32xf32>
    %218 = arith.divf %216, %217 : vector<4x32xf32>
    %219 = arith.mulf %212, %206 : vector<4x32xf32>
    %220 = arith.addf %197, %219 : vector<4x32xf32>
    %221 = math.tanh %220 : vector<4x32xf32>
    %cst_73 = arith.constant 1.000000e+00 : f32
    %222 = vector.broadcast %cst_73 : f32 to vector<4x32xf32>
    %223 = arith.subf %222, %218 : vector<4x32xf32>
    %224 = arith.mulf %223, %221 : vector<4x32xf32>
    %225 = arith.mulf %218, %194 : vector<4x32xf32>
    %226 = arith.addf %224, %225 : vector<4x32xf32>
    %227 = vector.extract_strided_slice %8 {offsets = [24, 0], sizes = [4, 32], strides = [1, 1]} : vector<32x32xf32> to vector<4x32xf32>
    %228 = vector.extract_strided_slice %15 {offsets = [24, 0], sizes = [4, 32], strides = [1, 1]} : vector<32x32xf32> to vector<4x32xf32>
    %229 = vector.extract_strided_slice %22 {offsets = [24, 0], sizes = [4, 32], strides = [1, 1]} : vector<32x32xf32> to vector<4x32xf32>
    %cst_74 = arith.constant dense<0.000000e+00> : vector<4x32xf32>
    %230 = tpu.matmul %226, %24, %cst_74 {dimension_numbers = #tpu.dot_dimension_numbers<[1], [0], [0], [1], [0, 0, 1, 1], [], []>} : vector<4x32xf32>, vector<32x32xf32>, vector<4x32xf32> -> vector<4x32xf32>
    %231 = vector.broadcast %30 : vector<1x32xf32> to vector<4x32xf32>
    %232 = arith.addf %230, %231 : vector<4x32xf32>
    %cst_75 = arith.constant dense<0.000000e+00> : vector<4x32xf32>
    %233 = tpu.matmul %226, %26, %cst_75 {dimension_numbers = #tpu.dot_dimension_numbers<[1], [0], [0], [1], [0, 0, 1, 1], [], []>} : vector<4x32xf32>, vector<32x32xf32>, vector<4x32xf32> -> vector<4x32xf32>
    %234 = vector.broadcast %32 : vector<1x32xf32> to vector<4x32xf32>
    %235 = arith.addf %233, %234 : vector<4x32xf32>
    %cst_76 = arith.constant dense<0.000000e+00> : vector<4x32xf32>
    %236 = tpu.matmul %226, %28, %cst_76 {dimension_numbers = #tpu.dot_dimension_numbers<[1], [0], [0], [1], [0, 0, 1, 1], [], []>} : vector<4x32xf32>, vector<32x32xf32>, vector<4x32xf32> -> vector<4x32xf32>
    %237 = vector.broadcast %34 : vector<1x32xf32> to vector<4x32xf32>
    %238 = arith.addf %236, %237 : vector<4x32xf32>
    %239 = arith.addf %227, %232 : vector<4x32xf32>
    %240 = arith.negf %239 : vector<4x32xf32>
    %241 = math.exp %240 : vector<4x32xf32>
    %cst_77 = arith.constant 1.000000e+00 : f32
    %242 = vector.broadcast %cst_77 : f32 to vector<4x32xf32>
    %243 = arith.addf %242, %241 : vector<4x32xf32>
    %244 = arith.divf %242, %243 : vector<4x32xf32>
    %245 = arith.addf %228, %235 : vector<4x32xf32>
    %246 = arith.negf %245 : vector<4x32xf32>
    %247 = math.exp %246 : vector<4x32xf32>
    %cst_78 = arith.constant 1.000000e+00 : f32
    %248 = vector.broadcast %cst_78 : f32 to vector<4x32xf32>
    %249 = arith.addf %248, %247 : vector<4x32xf32>
    %250 = arith.divf %248, %249 : vector<4x32xf32>
    %251 = arith.mulf %244, %238 : vector<4x32xf32>
    %252 = arith.addf %229, %251 : vector<4x32xf32>
    %253 = math.tanh %252 : vector<4x32xf32>
    %cst_79 = arith.constant 1.000000e+00 : f32
    %254 = vector.broadcast %cst_79 : f32 to vector<4x32xf32>
    %255 = arith.subf %254, %250 : vector<4x32xf32>
    %256 = arith.mulf %255, %253 : vector<4x32xf32>
    %257 = arith.mulf %250, %226 : vector<4x32xf32>
    %258 = arith.addf %256, %257 : vector<4x32xf32>
    %259 = vector.extract_strided_slice %8 {offsets = [28, 0], sizes = [4, 32], strides = [1, 1]} : vector<32x32xf32> to vector<4x32xf32>
    %260 = vector.extract_strided_slice %15 {offsets = [28, 0], sizes = [4, 32], strides = [1, 1]} : vector<32x32xf32> to vector<4x32xf32>
    %261 = vector.extract_strided_slice %22 {offsets = [28, 0], sizes = [4, 32], strides = [1, 1]} : vector<32x32xf32> to vector<4x32xf32>
    %cst_80 = arith.constant dense<0.000000e+00> : vector<4x32xf32>
    %262 = tpu.matmul %258, %24, %cst_80 {dimension_numbers = #tpu.dot_dimension_numbers<[1], [0], [0], [1], [0, 0, 1, 1], [], []>} : vector<4x32xf32>, vector<32x32xf32>, vector<4x32xf32> -> vector<4x32xf32>
    %263 = vector.broadcast %30 : vector<1x32xf32> to vector<4x32xf32>
    %264 = arith.addf %262, %263 : vector<4x32xf32>
    %cst_81 = arith.constant dense<0.000000e+00> : vector<4x32xf32>
    %265 = tpu.matmul %258, %26, %cst_81 {dimension_numbers = #tpu.dot_dimension_numbers<[1], [0], [0], [1], [0, 0, 1, 1], [], []>} : vector<4x32xf32>, vector<32x32xf32>, vector<4x32xf32> -> vector<4x32xf32>
    %266 = vector.broadcast %32 : vector<1x32xf32> to vector<4x32xf32>
    %267 = arith.addf %265, %266 : vector<4x32xf32>
    %cst_82 = arith.constant dense<0.000000e+00> : vector<4x32xf32>
    %268 = tpu.matmul %258, %28, %cst_82 {dimension_numbers = #tpu.dot_dimension_numbers<[1], [0], [0], [1], [0, 0, 1, 1], [], []>} : vector<4x32xf32>, vector<32x32xf32>, vector<4x32xf32> -> vector<4x32xf32>
    %269 = vector.broadcast %34 : vector<1x32xf32> to vector<4x32xf32>
    %270 = arith.addf %268, %269 : vector<4x32xf32>
    %271 = arith.addf %259, %264 : vector<4x32xf32>
    %272 = arith.negf %271 : vector<4x32xf32>
    %273 = math.exp %272 : vector<4x32xf32>
    %cst_83 = arith.constant 1.000000e+00 : f32
    %274 = vector.broadcast %cst_83 : f32 to vector<4x32xf32>
    %275 = arith.addf %274, %273 : vector<4x32xf32>
    %276 = arith.divf %274, %275 : vector<4x32xf32>
    %277 = arith.addf %260, %267 : vector<4x32xf32>
    %278 = arith.negf %277 : vector<4x32xf32>
    %279 = math.exp %278 : vector<4x32xf32>
    %cst_84 = arith.constant 1.000000e+00 : f32
    %280 = vector.broadcast %cst_84 : f32 to vector<4x32xf32>
    %281 = arith.addf %280, %279 : vector<4x32xf32>
    %282 = arith.divf %280, %281 : vector<4x32xf32>
    %283 = arith.mulf %276, %270 : vector<4x32xf32>
    %284 = arith.addf %261, %283 : vector<4x32xf32>
    %285 = math.tanh %284 : vector<4x32xf32>
    %cst_85 = arith.constant 1.000000e+00 : f32
    %286 = vector.broadcast %cst_85 : f32 to vector<4x32xf32>
    %287 = arith.subf %286, %282 : vector<4x32xf32>
    %288 = arith.mulf %287, %285 : vector<4x32xf32>
    %289 = arith.mulf %282, %258 : vector<4x32xf32>
    %290 = arith.addf %288, %289 : vector<4x32xf32>
    %c0_86 = arith.constant 0 : index
    %c0_87 = arith.constant 0 : index
    %291 = vector.load %arg1[%c0_86, %c0_87] : memref<32x16xf32, #tpu.memory_space<vmem>>, vector<32x16xf32>
    %c0_88 = arith.constant 0 : index
    %c0_89 = arith.constant 0 : index
    %c0_90 = arith.constant 0 : index
    %292 = vector.load %arg6[%c0_88, %c0_89, %c0_90] : memref<3x16x32xf32, #tpu.memory_space<vmem>>, vector<1x16x32xf32>
    %293 = vector.shape_cast %292 : vector<1x16x32xf32> to vector<16x32xf32>
    %cst_91 = arith.constant dense<0.000000e+00> : vector<32x32xf32>
    %294 = tpu.matmul %291, %293, %cst_91 {dimension_numbers = #tpu.dot_dimension_numbers<[1], [0], [0], [1], [0, 0, 1, 1], [], []>} : vector<32x16xf32>, vector<16x32xf32>, vector<32x32xf32> -> vector<32x32xf32>
    %c0_92 = arith.constant 0 : index
    %c0_93 = arith.constant 0 : index
    %c0_94 = arith.constant 0 : index
    %295 = vector.load %arg8[%c0_92, %c0_93, %c0_94] : memref<3x1x32xf32, #tpu.memory_space<vmem>>, vector<1x1x32xf32>
    %296 = vector.shape_cast %295 : vector<1x1x32xf32> to vector<1x32xf32>
    %297 = vector.broadcast %296 : vector<1x32xf32> to vector<32x32xf32>
    %298 = arith.addf %294, %297 : vector<32x32xf32>
    %c1_95 = arith.constant 1 : index
    %c0_96 = arith.constant 0 : index
    %c0_97 = arith.constant 0 : index
    %299 = vector.load %arg6[%c1_95, %c0_96, %c0_97] : memref<3x16x32xf32, #tpu.memory_space<vmem>>, vector<1x16x32xf32>
    %300 = vector.shape_cast %299 : vector<1x16x32xf32> to vector<16x32xf32>
    %cst_98 = arith.constant dense<0.000000e+00> : vector<32x32xf32>
    %301 = tpu.matmul %291, %300, %cst_98 {dimension_numbers = #tpu.dot_dimension_numbers<[1], [0], [0], [1], [0, 0, 1, 1], [], []>} : vector<32x16xf32>, vector<16x32xf32>, vector<32x32xf32> -> vector<32x32xf32>
    %c1_99 = arith.constant 1 : index
    %c0_100 = arith.constant 0 : index
    %c0_101 = arith.constant 0 : index
    %302 = vector.load %arg8[%c1_99, %c0_100, %c0_101] : memref<3x1x32xf32, #tpu.memory_space<vmem>>, vector<1x1x32xf32>
    %303 = vector.shape_cast %302 : vector<1x1x32xf32> to vector<1x32xf32>
    %304 = vector.broadcast %303 : vector<1x32xf32> to vector<32x32xf32>
    %305 = arith.addf %301, %304 : vector<32x32xf32>
    %c2_102 = arith.constant 2 : index
    %c0_103 = arith.constant 0 : index
    %c0_104 = arith.constant 0 : index
    %306 = vector.load %arg6[%c2_102, %c0_103, %c0_104] : memref<3x16x32xf32, #tpu.memory_space<vmem>>, vector<1x16x32xf32>
    %307 = vector.shape_cast %306 : vector<1x16x32xf32> to vector<16x32xf32>
    %cst_105 = arith.constant dense<0.000000e+00> : vector<32x32xf32>
    %308 = tpu.matmul %291, %307, %cst_105 {dimension_numbers = #tpu.dot_dimension_numbers<[1], [0], [0], [1], [0, 0, 1, 1], [], []>} : vector<32x16xf32>, vector<16x32xf32>, vector<32x32xf32> -> vector<32x32xf32>
    %c2_106 = arith.constant 2 : index
    %c0_107 = arith.constant 0 : index
    %c0_108 = arith.constant 0 : index
    %309 = vector.load %arg8[%c2_106, %c0_107, %c0_108] : memref<3x1x32xf32, #tpu.memory_space<vmem>>, vector<1x1x32xf32>
    %310 = vector.shape_cast %309 : vector<1x1x32xf32> to vector<1x32xf32>
    %311 = vector.broadcast %310 : vector<1x32xf32> to vector<32x32xf32>
    %312 = arith.addf %308, %311 : vector<32x32xf32>
    %c0_109 = arith.constant 0 : index
    %c0_110 = arith.constant 0 : index
    %c0_111 = arith.constant 0 : index
    %313 = vector.load %arg7[%c0_109, %c0_110, %c0_111] : memref<3x32x32xf32, #tpu.memory_space<vmem>>, vector<1x32x32xf32>
    %314 = vector.shape_cast %313 : vector<1x32x32xf32> to vector<32x32xf32>
    %c1_112 = arith.constant 1 : index
    %c0_113 = arith.constant 0 : index
    %c0_114 = arith.constant 0 : index
    %315 = vector.load %arg7[%c1_112, %c0_113, %c0_114] : memref<3x32x32xf32, #tpu.memory_space<vmem>>, vector<1x32x32xf32>
    %316 = vector.shape_cast %315 : vector<1x32x32xf32> to vector<32x32xf32>
    %c2_115 = arith.constant 2 : index
    %c0_116 = arith.constant 0 : index
    %c0_117 = arith.constant 0 : index
    %317 = vector.load %arg7[%c2_115, %c0_116, %c0_117] : memref<3x32x32xf32, #tpu.memory_space<vmem>>, vector<1x32x32xf32>
    %318 = vector.shape_cast %317 : vector<1x32x32xf32> to vector<32x32xf32>
    %c0_118 = arith.constant 0 : index
    %c0_119 = arith.constant 0 : index
    %c0_120 = arith.constant 0 : index
    %319 = vector.load %arg9[%c0_118, %c0_119, %c0_120] : memref<3x1x32xf32, #tpu.memory_space<vmem>>, vector<1x1x32xf32>
    %320 = vector.shape_cast %319 : vector<1x1x32xf32> to vector<1x32xf32>
    %c1_121 = arith.constant 1 : index
    %c0_122 = arith.constant 0 : index
    %c0_123 = arith.constant 0 : index
    %321 = vector.load %arg9[%c1_121, %c0_122, %c0_123] : memref<3x1x32xf32, #tpu.memory_space<vmem>>, vector<1x1x32xf32>
    %322 = vector.shape_cast %321 : vector<1x1x32xf32> to vector<1x32xf32>
    %c2_124 = arith.constant 2 : index
    %c0_125 = arith.constant 0 : index
    %c0_126 = arith.constant 0 : index
    %323 = vector.load %arg9[%c2_124, %c0_125, %c0_126] : memref<3x1x32xf32, #tpu.memory_space<vmem>>, vector<1x1x32xf32>
    %324 = vector.shape_cast %323 : vector<1x1x32xf32> to vector<1x32xf32>
    %325 = vector.extract_strided_slice %298 {offsets = [0, 0], sizes = [4, 32], strides = [1, 1]} : vector<32x32xf32> to vector<4x32xf32>
    %326 = vector.extract_strided_slice %305 {offsets = [0, 0], sizes = [4, 32], strides = [1, 1]} : vector<32x32xf32> to vector<4x32xf32>
    %327 = vector.extract_strided_slice %312 {offsets = [0, 0], sizes = [4, 32], strides = [1, 1]} : vector<32x32xf32> to vector<4x32xf32>
    %cst_127 = arith.constant dense<0.000000e+00> : vector<4x32xf32>
    %328 = tpu.matmul %290, %314, %cst_127 {dimension_numbers = #tpu.dot_dimension_numbers<[1], [0], [0], [1], [0, 0, 1, 1], [], []>} : vector<4x32xf32>, vector<32x32xf32>, vector<4x32xf32> -> vector<4x32xf32>
    %329 = vector.broadcast %320 : vector<1x32xf32> to vector<4x32xf32>
    %330 = arith.addf %328, %329 : vector<4x32xf32>
    %cst_128 = arith.constant dense<0.000000e+00> : vector<4x32xf32>
    %331 = tpu.matmul %290, %316, %cst_128 {dimension_numbers = #tpu.dot_dimension_numbers<[1], [0], [0], [1], [0, 0, 1, 1], [], []>} : vector<4x32xf32>, vector<32x32xf32>, vector<4x32xf32> -> vector<4x32xf32>
    %332 = vector.broadcast %322 : vector<1x32xf32> to vector<4x32xf32>
    %333 = arith.addf %331, %332 : vector<4x32xf32>
    %cst_129 = arith.constant dense<0.000000e+00> : vector<4x32xf32>
    %334 = tpu.matmul %290, %318, %cst_129 {dimension_numbers = #tpu.dot_dimension_numbers<[1], [0], [0], [1], [0, 0, 1, 1], [], []>} : vector<4x32xf32>, vector<32x32xf32>, vector<4x32xf32> -> vector<4x32xf32>
    %335 = vector.broadcast %324 : vector<1x32xf32> to vector<4x32xf32>
    %336 = arith.addf %334, %335 : vector<4x32xf32>
    %337 = arith.addf %325, %330 : vector<4x32xf32>
    %338 = arith.negf %337 : vector<4x32xf32>
    %339 = math.exp %338 : vector<4x32xf32>
    %cst_130 = arith.constant 1.000000e+00 : f32
    %340 = vector.broadcast %cst_130 : f32 to vector<4x32xf32>
    %341 = arith.addf %340, %339 : vector<4x32xf32>
    %342 = arith.divf %340, %341 : vector<4x32xf32>
    %343 = arith.addf %326, %333 : vector<4x32xf32>
    %344 = arith.negf %343 : vector<4x32xf32>
    %345 = math.exp %344 : vector<4x32xf32>
    %cst_131 = arith.constant 1.000000e+00 : f32
    %346 = vector.broadcast %cst_131 : f32 to vector<4x32xf32>
    %347 = arith.addf %346, %345 : vector<4x32xf32>
    %348 = arith.divf %346, %347 : vector<4x32xf32>
    %349 = arith.mulf %342, %336 : vector<4x32xf32>
    %350 = arith.addf %327, %349 : vector<4x32xf32>
    %351 = math.tanh %350 : vector<4x32xf32>
    %cst_132 = arith.constant 1.000000e+00 : f32
    %352 = vector.broadcast %cst_132 : f32 to vector<4x32xf32>
    %353 = arith.subf %352, %348 : vector<4x32xf32>
    %354 = arith.mulf %353, %351 : vector<4x32xf32>
    %355 = arith.mulf %348, %290 : vector<4x32xf32>
    %356 = arith.addf %354, %355 : vector<4x32xf32>
    %357 = vector.extract_strided_slice %298 {offsets = [4, 0], sizes = [4, 32], strides = [1, 1]} : vector<32x32xf32> to vector<4x32xf32>
    %358 = vector.extract_strided_slice %305 {offsets = [4, 0], sizes = [4, 32], strides = [1, 1]} : vector<32x32xf32> to vector<4x32xf32>
    %359 = vector.extract_strided_slice %312 {offsets = [4, 0], sizes = [4, 32], strides = [1, 1]} : vector<32x32xf32> to vector<4x32xf32>
    %cst_133 = arith.constant dense<0.000000e+00> : vector<4x32xf32>
    %360 = tpu.matmul %356, %314, %cst_133 {dimension_numbers = #tpu.dot_dimension_numbers<[1], [0], [0], [1], [0, 0, 1, 1], [], []>} : vector<4x32xf32>, vector<32x32xf32>, vector<4x32xf32> -> vector<4x32xf32>
    %361 = vector.broadcast %320 : vector<1x32xf32> to vector<4x32xf32>
    %362 = arith.addf %360, %361 : vector<4x32xf32>
    %cst_134 = arith.constant dense<0.000000e+00> : vector<4x32xf32>
    %363 = tpu.matmul %356, %316, %cst_134 {dimension_numbers = #tpu.dot_dimension_numbers<[1], [0], [0], [1], [0, 0, 1, 1], [], []>} : vector<4x32xf32>, vector<32x32xf32>, vector<4x32xf32> -> vector<4x32xf32>
    %364 = vector.broadcast %322 : vector<1x32xf32> to vector<4x32xf32>
    %365 = arith.addf %363, %364 : vector<4x32xf32>
    %cst_135 = arith.constant dense<0.000000e+00> : vector<4x32xf32>
    %366 = tpu.matmul %356, %318, %cst_135 {dimension_numbers = #tpu.dot_dimension_numbers<[1], [0], [0], [1], [0, 0, 1, 1], [], []>} : vector<4x32xf32>, vector<32x32xf32>, vector<4x32xf32> -> vector<4x32xf32>
    %367 = vector.broadcast %324 : vector<1x32xf32> to vector<4x32xf32>
    %368 = arith.addf %366, %367 : vector<4x32xf32>
    %369 = arith.addf %357, %362 : vector<4x32xf32>
    %370 = arith.negf %369 : vector<4x32xf32>
    %371 = math.exp %370 : vector<4x32xf32>
    %cst_136 = arith.constant 1.000000e+00 : f32
    %372 = vector.broadcast %cst_136 : f32 to vector<4x32xf32>
    %373 = arith.addf %372, %371 : vector<4x32xf32>
    %374 = arith.divf %372, %373 : vector<4x32xf32>
    %375 = arith.addf %358, %365 : vector<4x32xf32>
    %376 = arith.negf %375 : vector<4x32xf32>
    %377 = math.exp %376 : vector<4x32xf32>
    %cst_137 = arith.constant 1.000000e+00 : f32
    %378 = vector.broadcast %cst_137 : f32 to vector<4x32xf32>
    %379 = arith.addf %378, %377 : vector<4x32xf32>
    %380 = arith.divf %378, %379 : vector<4x32xf32>
    %381 = arith.mulf %374, %368 : vector<4x32xf32>
    %382 = arith.addf %359, %381 : vector<4x32xf32>
    %383 = math.tanh %382 : vector<4x32xf32>
    %cst_138 = arith.constant 1.000000e+00 : f32
    %384 = vector.broadcast %cst_138 : f32 to vector<4x32xf32>
    %385 = arith.subf %384, %380 : vector<4x32xf32>
    %386 = arith.mulf %385, %383 : vector<4x32xf32>
    %387 = arith.mulf %380, %356 : vector<4x32xf32>
    %388 = arith.addf %386, %387 : vector<4x32xf32>
    %389 = vector.extract_strided_slice %298 {offsets = [8, 0], sizes = [4, 32], strides = [1, 1]} : vector<32x32xf32> to vector<4x32xf32>
    %390 = vector.extract_strided_slice %305 {offsets = [8, 0], sizes = [4, 32], strides = [1, 1]} : vector<32x32xf32> to vector<4x32xf32>
    %391 = vector.extract_strided_slice %312 {offsets = [8, 0], sizes = [4, 32], strides = [1, 1]} : vector<32x32xf32> to vector<4x32xf32>
    %cst_139 = arith.constant dense<0.000000e+00> : vector<4x32xf32>
    %392 = tpu.matmul %388, %314, %cst_139 {dimension_numbers = #tpu.dot_dimension_numbers<[1], [0], [0], [1], [0, 0, 1, 1], [], []>} : vector<4x32xf32>, vector<32x32xf32>, vector<4x32xf32> -> vector<4x32xf32>
    %393 = vector.broadcast %320 : vector<1x32xf32> to vector<4x32xf32>
    %394 = arith.addf %392, %393 : vector<4x32xf32>
    %cst_140 = arith.constant dense<0.000000e+00> : vector<4x32xf32>
    %395 = tpu.matmul %388, %316, %cst_140 {dimension_numbers = #tpu.dot_dimension_numbers<[1], [0], [0], [1], [0, 0, 1, 1], [], []>} : vector<4x32xf32>, vector<32x32xf32>, vector<4x32xf32> -> vector<4x32xf32>
    %396 = vector.broadcast %322 : vector<1x32xf32> to vector<4x32xf32>
    %397 = arith.addf %395, %396 : vector<4x32xf32>
    %cst_141 = arith.constant dense<0.000000e+00> : vector<4x32xf32>
    %398 = tpu.matmul %388, %318, %cst_141 {dimension_numbers = #tpu.dot_dimension_numbers<[1], [0], [0], [1], [0, 0, 1, 1], [], []>} : vector<4x32xf32>, vector<32x32xf32>, vector<4x32xf32> -> vector<4x32xf32>
    %399 = vector.broadcast %324 : vector<1x32xf32> to vector<4x32xf32>
    %400 = arith.addf %398, %399 : vector<4x32xf32>
    %401 = arith.addf %389, %394 : vector<4x32xf32>
    %402 = arith.negf %401 : vector<4x32xf32>
    %403 = math.exp %402 : vector<4x32xf32>
    %cst_142 = arith.constant 1.000000e+00 : f32
    %404 = vector.broadcast %cst_142 : f32 to vector<4x32xf32>
    %405 = arith.addf %404, %403 : vector<4x32xf32>
    %406 = arith.divf %404, %405 : vector<4x32xf32>
    %407 = arith.addf %390, %397 : vector<4x32xf32>
    %408 = arith.negf %407 : vector<4x32xf32>
    %409 = math.exp %408 : vector<4x32xf32>
    %cst_143 = arith.constant 1.000000e+00 : f32
    %410 = vector.broadcast %cst_143 : f32 to vector<4x32xf32>
    %411 = arith.addf %410, %409 : vector<4x32xf32>
    %412 = arith.divf %410, %411 : vector<4x32xf32>
    %413 = arith.mulf %406, %400 : vector<4x32xf32>
    %414 = arith.addf %391, %413 : vector<4x32xf32>
    %415 = math.tanh %414 : vector<4x32xf32>
    %cst_144 = arith.constant 1.000000e+00 : f32
    %416 = vector.broadcast %cst_144 : f32 to vector<4x32xf32>
    %417 = arith.subf %416, %412 : vector<4x32xf32>
    %418 = arith.mulf %417, %415 : vector<4x32xf32>
    %419 = arith.mulf %412, %388 : vector<4x32xf32>
    %420 = arith.addf %418, %419 : vector<4x32xf32>
    %421 = vector.extract_strided_slice %298 {offsets = [12, 0], sizes = [4, 32], strides = [1, 1]} : vector<32x32xf32> to vector<4x32xf32>
    %422 = vector.extract_strided_slice %305 {offsets = [12, 0], sizes = [4, 32], strides = [1, 1]} : vector<32x32xf32> to vector<4x32xf32>
    %423 = vector.extract_strided_slice %312 {offsets = [12, 0], sizes = [4, 32], strides = [1, 1]} : vector<32x32xf32> to vector<4x32xf32>
    %cst_145 = arith.constant dense<0.000000e+00> : vector<4x32xf32>
    %424 = tpu.matmul %420, %314, %cst_145 {dimension_numbers = #tpu.dot_dimension_numbers<[1], [0], [0], [1], [0, 0, 1, 1], [], []>} : vector<4x32xf32>, vector<32x32xf32>, vector<4x32xf32> -> vector<4x32xf32>
    %425 = vector.broadcast %320 : vector<1x32xf32> to vector<4x32xf32>
    %426 = arith.addf %424, %425 : vector<4x32xf32>
    %cst_146 = arith.constant dense<0.000000e+00> : vector<4x32xf32>
    %427 = tpu.matmul %420, %316, %cst_146 {dimension_numbers = #tpu.dot_dimension_numbers<[1], [0], [0], [1], [0, 0, 1, 1], [], []>} : vector<4x32xf32>, vector<32x32xf32>, vector<4x32xf32> -> vector<4x32xf32>
    %428 = vector.broadcast %322 : vector<1x32xf32> to vector<4x32xf32>
    %429 = arith.addf %427, %428 : vector<4x32xf32>
    %cst_147 = arith.constant dense<0.000000e+00> : vector<4x32xf32>
    %430 = tpu.matmul %420, %318, %cst_147 {dimension_numbers = #tpu.dot_dimension_numbers<[1], [0], [0], [1], [0, 0, 1, 1], [], []>} : vector<4x32xf32>, vector<32x32xf32>, vector<4x32xf32> -> vector<4x32xf32>
    %431 = vector.broadcast %324 : vector<1x32xf32> to vector<4x32xf32>
    %432 = arith.addf %430, %431 : vector<4x32xf32>
    %433 = arith.addf %421, %426 : vector<4x32xf32>
    %434 = arith.negf %433 : vector<4x32xf32>
    %435 = math.exp %434 : vector<4x32xf32>
    %cst_148 = arith.constant 1.000000e+00 : f32
    %436 = vector.broadcast %cst_148 : f32 to vector<4x32xf32>
    %437 = arith.addf %436, %435 : vector<4x32xf32>
    %438 = arith.divf %436, %437 : vector<4x32xf32>
    %439 = arith.addf %422, %429 : vector<4x32xf32>
    %440 = arith.negf %439 : vector<4x32xf32>
    %441 = math.exp %440 : vector<4x32xf32>
    %cst_149 = arith.constant 1.000000e+00 : f32
    %442 = vector.broadcast %cst_149 : f32 to vector<4x32xf32>
    %443 = arith.addf %442, %441 : vector<4x32xf32>
    %444 = arith.divf %442, %443 : vector<4x32xf32>
    %445 = arith.mulf %438, %432 : vector<4x32xf32>
    %446 = arith.addf %423, %445 : vector<4x32xf32>
    %447 = math.tanh %446 : vector<4x32xf32>
    %cst_150 = arith.constant 1.000000e+00 : f32
    %448 = vector.broadcast %cst_150 : f32 to vector<4x32xf32>
    %449 = arith.subf %448, %444 : vector<4x32xf32>
    %450 = arith.mulf %449, %447 : vector<4x32xf32>
    %451 = arith.mulf %444, %420 : vector<4x32xf32>
    %452 = arith.addf %450, %451 : vector<4x32xf32>
    %453 = vector.extract_strided_slice %298 {offsets = [16, 0], sizes = [4, 32], strides = [1, 1]} : vector<32x32xf32> to vector<4x32xf32>
    %454 = vector.extract_strided_slice %305 {offsets = [16, 0], sizes = [4, 32], strides = [1, 1]} : vector<32x32xf32> to vector<4x32xf32>
    %455 = vector.extract_strided_slice %312 {offsets = [16, 0], sizes = [4, 32], strides = [1, 1]} : vector<32x32xf32> to vector<4x32xf32>
    %cst_151 = arith.constant dense<0.000000e+00> : vector<4x32xf32>
    %456 = tpu.matmul %452, %314, %cst_151 {dimension_numbers = #tpu.dot_dimension_numbers<[1], [0], [0], [1], [0, 0, 1, 1], [], []>} : vector<4x32xf32>, vector<32x32xf32>, vector<4x32xf32> -> vector<4x32xf32>
    %457 = vector.broadcast %320 : vector<1x32xf32> to vector<4x32xf32>
    %458 = arith.addf %456, %457 : vector<4x32xf32>
    %cst_152 = arith.constant dense<0.000000e+00> : vector<4x32xf32>
    %459 = tpu.matmul %452, %316, %cst_152 {dimension_numbers = #tpu.dot_dimension_numbers<[1], [0], [0], [1], [0, 0, 1, 1], [], []>} : vector<4x32xf32>, vector<32x32xf32>, vector<4x32xf32> -> vector<4x32xf32>
    %460 = vector.broadcast %322 : vector<1x32xf32> to vector<4x32xf32>
    %461 = arith.addf %459, %460 : vector<4x32xf32>
    %cst_153 = arith.constant dense<0.000000e+00> : vector<4x32xf32>
    %462 = tpu.matmul %452, %318, %cst_153 {dimension_numbers = #tpu.dot_dimension_numbers<[1], [0], [0], [1], [0, 0, 1, 1], [], []>} : vector<4x32xf32>, vector<32x32xf32>, vector<4x32xf32> -> vector<4x32xf32>
    %463 = vector.broadcast %324 : vector<1x32xf32> to vector<4x32xf32>
    %464 = arith.addf %462, %463 : vector<4x32xf32>
    %465 = arith.addf %453, %458 : vector<4x32xf32>
    %466 = arith.negf %465 : vector<4x32xf32>
    %467 = math.exp %466 : vector<4x32xf32>
    %cst_154 = arith.constant 1.000000e+00 : f32
    %468 = vector.broadcast %cst_154 : f32 to vector<4x32xf32>
    %469 = arith.addf %468, %467 : vector<4x32xf32>
    %470 = arith.divf %468, %469 : vector<4x32xf32>
    %471 = arith.addf %454, %461 : vector<4x32xf32>
    %472 = arith.negf %471 : vector<4x32xf32>
    %473 = math.exp %472 : vector<4x32xf32>
    %cst_155 = arith.constant 1.000000e+00 : f32
    %474 = vector.broadcast %cst_155 : f32 to vector<4x32xf32>
    %475 = arith.addf %474, %473 : vector<4x32xf32>
    %476 = arith.divf %474, %475 : vector<4x32xf32>
    %477 = arith.mulf %470, %464 : vector<4x32xf32>
    %478 = arith.addf %455, %477 : vector<4x32xf32>
    %479 = math.tanh %478 : vector<4x32xf32>
    %cst_156 = arith.constant 1.000000e+00 : f32
    %480 = vector.broadcast %cst_156 : f32 to vector<4x32xf32>
    %481 = arith.subf %480, %476 : vector<4x32xf32>
    %482 = arith.mulf %481, %479 : vector<4x32xf32>
    %483 = arith.mulf %476, %452 : vector<4x32xf32>
    %484 = arith.addf %482, %483 : vector<4x32xf32>
    %485 = vector.extract_strided_slice %298 {offsets = [20, 0], sizes = [4, 32], strides = [1, 1]} : vector<32x32xf32> to vector<4x32xf32>
    %486 = vector.extract_strided_slice %305 {offsets = [20, 0], sizes = [4, 32], strides = [1, 1]} : vector<32x32xf32> to vector<4x32xf32>
    %487 = vector.extract_strided_slice %312 {offsets = [20, 0], sizes = [4, 32], strides = [1, 1]} : vector<32x32xf32> to vector<4x32xf32>
    %cst_157 = arith.constant dense<0.000000e+00> : vector<4x32xf32>
    %488 = tpu.matmul %484, %314, %cst_157 {dimension_numbers = #tpu.dot_dimension_numbers<[1], [0], [0], [1], [0, 0, 1, 1], [], []>} : vector<4x32xf32>, vector<32x32xf32>, vector<4x32xf32> -> vector<4x32xf32>
    %489 = vector.broadcast %320 : vector<1x32xf32> to vector<4x32xf32>
    %490 = arith.addf %488, %489 : vector<4x32xf32>
    %cst_158 = arith.constant dense<0.000000e+00> : vector<4x32xf32>
    %491 = tpu.matmul %484, %316, %cst_158 {dimension_numbers = #tpu.dot_dimension_numbers<[1], [0], [0], [1], [0, 0, 1, 1], [], []>} : vector<4x32xf32>, vector<32x32xf32>, vector<4x32xf32> -> vector<4x32xf32>
    %492 = vector.broadcast %322 : vector<1x32xf32> to vector<4x32xf32>
    %493 = arith.addf %491, %492 : vector<4x32xf32>
    %cst_159 = arith.constant dense<0.000000e+00> : vector<4x32xf32>
    %494 = tpu.matmul %484, %318, %cst_159 {dimension_numbers = #tpu.dot_dimension_numbers<[1], [0], [0], [1], [0, 0, 1, 1], [], []>} : vector<4x32xf32>, vector<32x32xf32>, vector<4x32xf32> -> vector<4x32xf32>
    %495 = vector.broadcast %324 : vector<1x32xf32> to vector<4x32xf32>
    %496 = arith.addf %494, %495 : vector<4x32xf32>
    %497 = arith.addf %485, %490 : vector<4x32xf32>
    %498 = arith.negf %497 : vector<4x32xf32>
    %499 = math.exp %498 : vector<4x32xf32>
    %cst_160 = arith.constant 1.000000e+00 : f32
    %500 = vector.broadcast %cst_160 : f32 to vector<4x32xf32>
    %501 = arith.addf %500, %499 : vector<4x32xf32>
    %502 = arith.divf %500, %501 : vector<4x32xf32>
    %503 = arith.addf %486, %493 : vector<4x32xf32>
    %504 = arith.negf %503 : vector<4x32xf32>
    %505 = math.exp %504 : vector<4x32xf32>
    %cst_161 = arith.constant 1.000000e+00 : f32
    %506 = vector.broadcast %cst_161 : f32 to vector<4x32xf32>
    %507 = arith.addf %506, %505 : vector<4x32xf32>
    %508 = arith.divf %506, %507 : vector<4x32xf32>
    %509 = arith.mulf %502, %496 : vector<4x32xf32>
    %510 = arith.addf %487, %509 : vector<4x32xf32>
    %511 = math.tanh %510 : vector<4x32xf32>
    %cst_162 = arith.constant 1.000000e+00 : f32
    %512 = vector.broadcast %cst_162 : f32 to vector<4x32xf32>
    %513 = arith.subf %512, %508 : vector<4x32xf32>
    %514 = arith.mulf %513, %511 : vector<4x32xf32>
    %515 = arith.mulf %508, %484 : vector<4x32xf32>
    %516 = arith.addf %514, %515 : vector<4x32xf32>
    %517 = vector.extract_strided_slice %298 {offsets = [24, 0], sizes = [4, 32], strides = [1, 1]} : vector<32x32xf32> to vector<4x32xf32>
    %518 = vector.extract_strided_slice %305 {offsets = [24, 0], sizes = [4, 32], strides = [1, 1]} : vector<32x32xf32> to vector<4x32xf32>
    %519 = vector.extract_strided_slice %312 {offsets = [24, 0], sizes = [4, 32], strides = [1, 1]} : vector<32x32xf32> to vector<4x32xf32>
    %cst_163 = arith.constant dense<0.000000e+00> : vector<4x32xf32>
    %520 = tpu.matmul %516, %314, %cst_163 {dimension_numbers = #tpu.dot_dimension_numbers<[1], [0], [0], [1], [0, 0, 1, 1], [], []>} : vector<4x32xf32>, vector<32x32xf32>, vector<4x32xf32> -> vector<4x32xf32>
    %521 = vector.broadcast %320 : vector<1x32xf32> to vector<4x32xf32>
    %522 = arith.addf %520, %521 : vector<4x32xf32>
    %cst_164 = arith.constant dense<0.000000e+00> : vector<4x32xf32>
    %523 = tpu.matmul %516, %316, %cst_164 {dimension_numbers = #tpu.dot_dimension_numbers<[1], [0], [0], [1], [0, 0, 1, 1], [], []>} : vector<4x32xf32>, vector<32x32xf32>, vector<4x32xf32> -> vector<4x32xf32>
    %524 = vector.broadcast %322 : vector<1x32xf32> to vector<4x32xf32>
    %525 = arith.addf %523, %524 : vector<4x32xf32>
    %cst_165 = arith.constant dense<0.000000e+00> : vector<4x32xf32>
    %526 = tpu.matmul %516, %318, %cst_165 {dimension_numbers = #tpu.dot_dimension_numbers<[1], [0], [0], [1], [0, 0, 1, 1], [], []>} : vector<4x32xf32>, vector<32x32xf32>, vector<4x32xf32> -> vector<4x32xf32>
    %527 = vector.broadcast %324 : vector<1x32xf32> to vector<4x32xf32>
    %528 = arith.addf %526, %527 : vector<4x32xf32>
    %529 = arith.addf %517, %522 : vector<4x32xf32>
    %530 = arith.negf %529 : vector<4x32xf32>
    %531 = math.exp %530 : vector<4x32xf32>
    %cst_166 = arith.constant 1.000000e+00 : f32
    %532 = vector.broadcast %cst_166 : f32 to vector<4x32xf32>
    %533 = arith.addf %532, %531 : vector<4x32xf32>
    %534 = arith.divf %532, %533 : vector<4x32xf32>
    %535 = arith.addf %518, %525 : vector<4x32xf32>
    %536 = arith.negf %535 : vector<4x32xf32>
    %537 = math.exp %536 : vector<4x32xf32>
    %cst_167 = arith.constant 1.000000e+00 : f32
    %538 = vector.broadcast %cst_167 : f32 to vector<4x32xf32>
    %539 = arith.addf %538, %537 : vector<4x32xf32>
    %540 = arith.divf %538, %539 : vector<4x32xf32>
    %541 = arith.mulf %534, %528 : vector<4x32xf32>
    %542 = arith.addf %519, %541 : vector<4x32xf32>
    %543 = math.tanh %542 : vector<4x32xf32>
    %cst_168 = arith.constant 1.000000e+00 : f32
    %544 = vector.broadcast %cst_168 : f32 to vector<4x32xf32>
    %545 = arith.subf %544, %540 : vector<4x32xf32>
    %546 = arith.mulf %545, %543 : vector<4x32xf32>
    %547 = arith.mulf %540, %516 : vector<4x32xf32>
    %548 = arith.addf %546, %547 : vector<4x32xf32>
    %549 = vector.extract_strided_slice %298 {offsets = [28, 0], sizes = [4, 32], strides = [1, 1]} : vector<32x32xf32> to vector<4x32xf32>
    %550 = vector.extract_strided_slice %305 {offsets = [28, 0], sizes = [4, 32], strides = [1, 1]} : vector<32x32xf32> to vector<4x32xf32>
    %551 = vector.extract_strided_slice %312 {offsets = [28, 0], sizes = [4, 32], strides = [1, 1]} : vector<32x32xf32> to vector<4x32xf32>
    %cst_169 = arith.constant dense<0.000000e+00> : vector<4x32xf32>
    %552 = tpu.matmul %548, %314, %cst_169 {dimension_numbers = #tpu.dot_dimension_numbers<[1], [0], [0], [1], [0, 0, 1, 1], [], []>} : vector<4x32xf32>, vector<32x32xf32>, vector<4x32xf32> -> vector<4x32xf32>
    %553 = vector.broadcast %320 : vector<1x32xf32> to vector<4x32xf32>
    %554 = arith.addf %552, %553 : vector<4x32xf32>
    %cst_170 = arith.constant dense<0.000000e+00> : vector<4x32xf32>
    %555 = tpu.matmul %548, %316, %cst_170 {dimension_numbers = #tpu.dot_dimension_numbers<[1], [0], [0], [1], [0, 0, 1, 1], [], []>} : vector<4x32xf32>, vector<32x32xf32>, vector<4x32xf32> -> vector<4x32xf32>
    %556 = vector.broadcast %322 : vector<1x32xf32> to vector<4x32xf32>
    %557 = arith.addf %555, %556 : vector<4x32xf32>
    %cst_171 = arith.constant dense<0.000000e+00> : vector<4x32xf32>
    %558 = tpu.matmul %548, %318, %cst_171 {dimension_numbers = #tpu.dot_dimension_numbers<[1], [0], [0], [1], [0, 0, 1, 1], [], []>} : vector<4x32xf32>, vector<32x32xf32>, vector<4x32xf32> -> vector<4x32xf32>
    %559 = vector.broadcast %324 : vector<1x32xf32> to vector<4x32xf32>
    %560 = arith.addf %558, %559 : vector<4x32xf32>
    %561 = arith.addf %549, %554 : vector<4x32xf32>
    %562 = arith.negf %561 : vector<4x32xf32>
    %563 = math.exp %562 : vector<4x32xf32>
    %cst_172 = arith.constant 1.000000e+00 : f32
    %564 = vector.broadcast %cst_172 : f32 to vector<4x32xf32>
    %565 = arith.addf %564, %563 : vector<4x32xf32>
    %566 = arith.divf %564, %565 : vector<4x32xf32>
    %567 = arith.addf %550, %557 : vector<4x32xf32>
    %568 = arith.negf %567 : vector<4x32xf32>
    %569 = math.exp %568 : vector<4x32xf32>
    %cst_173 = arith.constant 1.000000e+00 : f32
    %570 = vector.broadcast %cst_173 : f32 to vector<4x32xf32>
    %571 = arith.addf %570, %569 : vector<4x32xf32>
    %572 = arith.divf %570, %571 : vector<4x32xf32>
    %573 = arith.mulf %566, %560 : vector<4x32xf32>
    %574 = arith.addf %551, %573 : vector<4x32xf32>
    %575 = math.tanh %574 : vector<4x32xf32>
    %cst_174 = arith.constant 1.000000e+00 : f32
    %576 = vector.broadcast %cst_174 : f32 to vector<4x32xf32>
    %577 = arith.subf %576, %572 : vector<4x32xf32>
    %578 = arith.mulf %577, %575 : vector<4x32xf32>
    %579 = arith.mulf %572, %548 : vector<4x32xf32>
    %580 = arith.addf %578, %579 : vector<4x32xf32>
    %c0_175 = arith.constant 0 : index
    %c0_176 = arith.constant 0 : index
    %581 = vector.load %arg10[%c0_175, %c0_176] : memref<32x16xf32, #tpu.memory_space<vmem>>, vector<32x16xf32>
    %cst_177 = arith.constant dense<0.000000e+00> : vector<4x16xf32>
    %582 = tpu.matmul %580, %581, %cst_177 {dimension_numbers = #tpu.dot_dimension_numbers<[1], [0], [0], [1], [0, 0, 1, 1], [], []>} : vector<4x32xf32>, vector<32x16xf32>, vector<4x16xf32> -> vector<4x16xf32>
    %c0_178 = arith.constant 0 : index
    %c0_179 = arith.constant 0 : index
    %583 = vector.load %arg11[%c0_178, %c0_179] : memref<1x16xf32, #tpu.memory_space<vmem>>, vector<1x16xf32>
    %584 = vector.broadcast %583 : vector<1x16xf32> to vector<4x16xf32>
    %585 = arith.addf %582, %584 : vector<4x16xf32>
    %cst_180 = arith.constant dense<0xFF800000> : vector<4xf32>
    %586 = vector.multi_reduction <maximumf>, %585, %cst_180 [1] : vector<4x16xf32> to vector<4xf32>
    %587 = vector.shape_cast %586 : vector<4xf32> to vector<4x1xf32>
    %588 = vector.broadcast %587 : vector<4x1xf32> to vector<4x16xf32>
    %589 = arith.subf %585, %588 : vector<4x16xf32>
    %590 = math.exp %589 : vector<4x16xf32>
    %cst_181 = arith.constant dense<0.000000e+00> : vector<4xf32>
    %591 = vector.multi_reduction <add>, %590, %cst_181 [1] : vector<4x16xf32> to vector<4xf32>
    %592 = vector.shape_cast %591 : vector<4xf32> to vector<4x1xf32>
    %593 = math.log %592 : vector<4x1xf32>
    %594 = vector.broadcast %593 : vector<4x1xf32> to vector<4x16xf32>
    %595 = arith.subf %589, %594 : vector<4x16xf32>
    %c0_182 = arith.constant 0 : index
    %c0_183 = arith.constant 0 : index
    %596 = vector.load %arg12[%c0_182, %c0_183] : memref<4x16xf32, #tpu.memory_space<vmem>>, vector<4x16xf32>
    tpu.vector_store %arg12[%c0_182, %c0_183], %595 {strides = array<i32>} : memref<4x16xf32, #tpu.memory_space<vmem>>, vector<4x16xf32>,
    return
  }
}

</mosaic_0001>

<bundles_post_ra>
// kernel: tpu_custom_call.1
= control target key start
LH: loop header
LB: loop body
LE: loop exit
PB: predicated region body
PF: predicated region fallthrough
CT: control target
= control target key end

     0   :  { %17 = vsyncpa [#allocation3], 0  ;;  %s7160_s0 = inlined_call_operand.vmem [shape: f32[32,16], index: 0, kind: input, shape index: {}]   ;;  %s7161_s1 = inlined_call_operand.vmem [shape: f32[32,16], index: 1, kind: input, shape index: {}]   ;;  %s7162_s2 = inlined_call_operand.vmem [shape: f32[3,16,32], index: 2, kind: input, shape index: {}]   ;;  %s7163_s3 = inlined_call_operand.vmem [shape: f32[3,32,32], index: 3, kind: input, shape index: {}]   ;;  %s7164_s4 = inlined_call_operand.hbm [shape: f32[3,1,32], index: 4, kind: input, shape index: {}]   ;;  %s7165_s5 = inlined_call_operand.hbm [shape: f32[3,1,32], index: 5, kind: input, shape index: {}]   ;;  %s7166_s6 = inlined_call_operand.hbm [shape: f32[3,16,32], index: 6, kind: input, shape index: {}]   ;;  %s7167_s7 = inlined_call_operand.hbm [shape: f32[3,32,32], index: 7, kind: input, shape index: {}]   ;;  %s7168_s8 = inlined_call_operand.vmem [shape: f32[3,1,32], index: 8, kind: input, shape index: {}]   ;;  %s7169_s9 = inlined_call_operand.vmem [shape: f32[3,1,32], index: 9, kind: input, shape index: {}]   ;;  %s7170_s10 = inlined_call_operand.vmem [shape: f32[32,16], index: 10, kind: input, shape index: {}]   ;;  %s7171_s11 = inlined_call_operand.vmem [shape: f32[1,16], index: 11, kind: input, shape index: {}]   ;;  %s7172_s12 = inlined_call_operand.hbm [shape: f32[4,16], index: 12, kind: output, shape index: {}]  }
   0x1   :  { %18 = vsyncpa [#allocation6], 0 }
   0x2   :  { %19 = vsyncpa [#allocation9], 0 }
   0x3   :  { %20 = vsyncpa [#allocation4], 0  ;;  %s6364_s21 = smov [#allocation5]   ;;  %s6365_s23 = smov [#allocation2]  }
   0x4   :  { %s46_s22 = sshll.u32 %s6364_s21, 4  ;;  %s34_s24 = sshll.u32 %s6365_s23, 4  ;;  %s47_s22 = int_to_ptr.vmem [resolvable:$true] %s46_s22  ;;  %s6441_s24 = int_to_ptr.vmem [resolvable:$true] %s34_s24 }
   0x5   :  { %s6246_s27 = scalar_lea.hbm %s7165_s5, 48 }
   0x6   :  { %p6247_p0 = scmp.ne.s32.totalorder %s7165_s5, %s6246_s27  ;;  %p6250_p1 = scmp.lt.u32.totalorder %s6246_s27, %s7165_s5 }
   0x8   :  { %p6252_p2 = pnand %p6250_p1, %p6247_p0 }
   0xa   :  { %6255 = shalt.err (!%p6252_p2)
}
   0xb   :  { %s6256_s14 = scalar_lea.vmem %s47_s22, 48  ;;  %s6260_s15 = scalar_lea.vmem %s47_s22, 64 }
   0xc   :  { %p6257_p3 = scmp.ne.s32.totalorder %s47_s22, %s6256_s14  ;;  %p6261_p4 = scmp.lt.s32.totalorder %s47_s22, %s47_s22 }
   0xd   :  { %p6262_p5 = scmp.lt.s32.totalorder %s6260_s15, %s6256_s14 }
   0xf   :  { %p6263_p6 = por %p6262_p5, %p6261_p4 }
  0x11   :  { %p6264_p7 = pnand %p6263_p6, %p6257_p3 }
  0x13   :  { %6267 = shalt.err (!%p6264_p7)
}
  0x14   :  { %s6366_s16 = smov 16   ;;  %s6367_s17 = smov 1  }
  0x15   :  { %52 = dma.hbm_to_vmem [thread:$0]  %s7165_s5, 48, %s47_s22, [#allocation6], %s6366_s16, %s6366_s16, %s6367_s17  }
  0x16   :  { %s6268_s23 = scalar_lea.hbm %s7164_s4, 48 }
  0x17   :  { %p6269_p8 = scmp.ne.s32.totalorder %s7164_s4, %s6268_s23  ;;  %p6272_p9 = scmp.lt.u32.totalorder %s6268_s23, %s7164_s4 }
  0x19   :  { %p6274_p10 = pnand %p6272_p9, %p6269_p8 }
  0x1b   :  { %6277 = shalt.err (!%p6274_p10)
}
  0x1c   :  { %s6278_s29 = scalar_lea.vmem %s6441_s24, 48  ;;  %s6282_s5 = scalar_lea.vmem %s6441_s24, 64 }
  0x1d   :  { %p6279_p11 = scmp.ne.s32.totalorder %s6441_s24, %s6278_s29  ;;  %p6283_p12 = scmp.lt.s32.totalorder %s6441_s24, %s6441_s24 }
  0x1e   :  { %p6284_p13 = scmp.lt.s32.totalorder %s6282_s5, %s6278_s29 }
  0x20   :  { %p6285_p0 = por %p6284_p13, %p6283_p12 }
  0x22   :  { %p6286_p1 = pnand %p6285_p0, %p6279_p11 }
  0x24   :  { %6289 = shalt.err (!%p6286_p1)
}
  0x25   :  { %40 = dma.hbm_to_vmem [thread:$0]  %s7164_s4, 48, %s6441_s24, [#allocation3], %s6366_s16, %s6366_s16, %s6367_s17  }
  0x26   :  { %s6368_s13 = smov [#allocation7]   ;;  %s6290_s19 = scalar_lea.hbm %s7166_s6, 768 }
  0x27   :  { %s58_s14 = sshll.u32 %s6368_s13, 4  ;;  %p6291_p2 = scmp.ne.s32.totalorder %s7166_s6, %s6290_s19  ;;  %s59_s14 = int_to_ptr.vmem [resolvable:$true] %s58_s14 }
  0x28   :  { %p6294_p3 = scmp.lt.u32.totalorder %s6290_s19, %s7166_s6 }
  0x2a   :  { %p6296_p4 = pnand %p6294_p3, %p6291_p2 }
  0x2c   :  { %6299 = shalt.err (!%p6296_p4)
}
  0x2d   :  { %s6300_s26 = scalar_lea.vmem %s59_s14, 768  ;;  %p6305_p6 = scmp.lt.s32.totalorder %s59_s14, %s59_s14 }
  0x2e   :  { %p6301_p5 = scmp.ne.s32.totalorder %s59_s14, %s6300_s26  ;;  %p6306_p7 = scmp.lt.s32.totalorder %s6300_s26, %s6300_s26 }
  0x30   :  { %p6307_p8 = por %p6306_p7, %p6305_p6 }
  0x32   :  { %p6308_p9 = pnand %p6307_p8, %p6301_p5 }
  0x34   :  { %6311 = shalt.err (!%p6308_p9)
}
  0x35   :  { %s6369_s4 = smov 128   ;;  %s6370_s24 = smov 8  }
  0x36   :  { %64 = dma.hbm_to_vmem [thread:$0]  %s7166_s6, 768, %s59_s14, [#allocation6], %s6369_s4, %s6369_s4, %s6370_s24  }
  0x37   :  { %s6371_s27 = smov [#allocation8]   ;;  %s6312_s22 = scalar_lea.hbm %s7167_s7, 1536 }
  0x38   :  { %s70_s28 = sshll.u32 %s6371_s27, 4  ;;  %p6313_p10 = scmp.ne.s32.totalorder %s7167_s7, %s6312_s22  ;;  %s71_s28 = int_to_ptr.vmem [resolvable:$true] %s70_s28 }
  0x39   :  { %p6316_p11 = scmp.lt.u32.totalorder %s6312_s22, %s7167_s7 }
  0x3b   :  { %p6318_p12 = pnand %p6316_p11, %p6313_p10 }
  0x3d   :  { %6321 = shalt.err (!%p6318_p12)
}
  0x3e   :  { %s6322_s19 = scalar_lea.vmem %s71_s28, 1536  ;;  %p6327_p0 = scmp.lt.s32.totalorder %s71_s28, %s71_s28 }
  0x3f   :  { %p6323_p13 = scmp.ne.s32.totalorder %s71_s28, %s6322_s19  ;;  %p6328_p1 = scmp.lt.s32.totalorder %s6322_s19, %s6322_s19 }
  0x41   :  { %p6329_p2 = por %p6328_p1, %p6327_p0 }
  0x43   :  { %p6330_p3 = pnand %p6329_p2, %p6323_p13 }
  0x45   :  { %6333 = shalt.err (!%p6330_p3)
}
  0x46   :  { %76 = dma.hbm_to_vmem [thread:$0]  %s7167_s7, 1536, %s71_s28, [#allocation9], %s6369_s4, %s6369_s4, %s6370_s24  }
  0x47   :  { %6356 = dma.done.wait [#allocation3], 48  }
  0x48   :  { %6357 = vsyncadd [#allocation3], 4294967248 }
  0x49   :  { %6358 = dma.done.wait [#allocation6], 816  }
  0x4a   :  { %6359 = vsyncadd [#allocation6], 4294966480 }
  0x4b   :  { %6360 = dma.done.wait [#allocation9], 1536  }
  0x4c   :  { %6361 = vsyncadd [#allocation9], 4294965760  ;;  %vm110_vm0 = vcmask 130048   ;;  %v101_v0 = vld [vmem:[%s7162_s2] sm:$0xff]  ;;  %v102_v1 = vld [vmem:[%s7162_s2 + $0x8] sm:$0xff]  ;;  %v6372_v23 = vmov 0.0|0.0  }
  0x4d   :  { %v97_v2 = vld [vmem:[%s7160_s0] sm:$0xff]  ;;  %v5750_v3 = vpack.c.bf16 %v102_v1, %v101_v0  ;;  %v99_v4 = vld [vmem:[%s7160_s0 + $0x10] sm:$0xff]  ;;  %v4745_v6 = vld [vmem:[%s7162_s2 + $0x18] sm:$0xff]  ;;  %vm6373_vm1 = vmmov 0   ;;  %v6374_v29 = vmov 0.0   ;;  %vm425_vm2 = vcmask 261120  }
  0x4e   :  { %5155 = vmatprep.mubr.msk.f32.mxu0 %vm110_vm0, %v97_v2  ;;  %5158 = vmatprep.mubr.msk.f32.mxu1 %vm110_vm0, %v99_v4  ;;  %v4744_v5 = vld [vmem:[%s7162_s2 + $0x10] sm:$0xff]  ;;  %v4751_v7 = vld [vmem:[%s7162_s2 + $0x20] sm:$0xff]  ;;  %v4752_v9 = vld [vmem:[%s7162_s2 + $0x28] sm:$0xff]  ;;  %vm4708_vm3 = vcmask 125952   ;;  %s6375_s6 = smov [#allocation10]  }
  0x4f   :  { %5751 = vmatprep.subr.bf16.mxu0 %v5750_v3  ;;  %6068 = vmatprep.subr.bf16.mxu1 %v5750_v3  ;;  %v5754_v8 = vpack.c.bf16 %v4745_v6, %v4744_v5  ;;  %v98_v10 = vld [vmem:[%s7160_s0 + $0x8] sm:$0xff]  ;;  %v100_v11 = vld [vmem:[%s7160_s0 + $0x18] sm:$0xff]  ;;  %v5758_v12 = vpack.c.bf16 %v4752_v9, %v4751_v7  ;;  %v400_v13 = vld [vmem:[%s7163_s3] sm:$0xff] }
  0x50   :  { %5753 = vmatpush3.bf16.msra.mxu0 %v5750_v3  ;;  %6069 = vmatpush3.bf16.msra.mxu1 %v5750_v3  ;;  %v401_v14 = vld [vmem:[%s7163_s3 + $0x8] sm:$0xff]  ;;  %v4758_v15 = vld [vmem:[%s7163_s3 + $0x20] sm:$0xff]  ;;  %v402_v19 = vld [vmem:[%s7163_s3 + $0x10] sm:$0xff] }
  0x51   :  { %5755 = vmatprep.subr.bf16.mxu1 %v5754_v8  ;;  %v4759_v16 = vld [vmem:[%s7163_s3 + $0x28] sm:$0xff]  ;;  %5759 = vmatprep.subr.bf16.mxu0 %v5758_v12  ;;  %v6543_v17 = vpack.c.bf16 %v401_v14, %v400_v13  ;;  %v403_v20 = vld [vmem:[%s7163_s3 + $0x18] sm:$0xff]  ;;  %v4760_v21 = vld [vmem:[%s7163_s3 + $0x30] sm:$0xff] }
  0x52   :  { %v6545_v18 = vpack.c.bf16 %v4759_v16, %v4758_v15  ;;  %v4761_v22 = vld [vmem:[%s7163_s3 + $0x38] sm:$0xff]  ;;  %v6567_v24 = vpack.c.bf16 %v403_v20, %v402_v19  ;;  %v4762_v26 = vld [vmem:[%s7163_s3 + $0x40] sm:$0xff]  ;;  %v4763_v27 = vld [vmem:[%s7163_s3 + $0x48] sm:$0xff] }
  0x53   :  { %5156 = vmatmul.mubr.msk.f32.vlgmr.msra.gmra.mrb[0].mxu0 %vm110_vm0, %v98_v10  ;;  %5159 = vmatmul.mubr.msk.f32.vlgmr.msra.gmra.mrb[0].mxu1 %vm110_vm0, %v100_v11  ;;  %v6569_v25 = vpack.c.bf16 %v4761_v22, %v4760_v21  ;;  %v6585_v28 = vpack.c.bf16 %v4763_v27, %v4762_v26  ;;  %v4764_v30 = vld [vmem:[%s7163_s3 + $0x50] sm:$0xff]  ;;  %v4765_v31 = vld [vmem:[%s7163_s3 + $0x58] sm:$0xff]  ;;  %v4739_v33 = vld [vmem:[#allocation2] ss:$0 sm:$0xff] }
  0x54   :  { %5757 = vmatpush3.bf16.msra.mxu1 %v5754_v8  ;;  %5761 = vmatpush3.bf16.msra.mxu0 %v5758_v12  ;;  %v6602_v32 = vpack.c.bf16 %v4765_v31, %v4764_v30  ;;  %v4746_v41 = vld [vmem:[#allocation2 + $0x1] ss:$0 sm:$0xff]  ;;  %v4753_v42 = vld [vmem:[#allocation2 + $0x2] ss:$0 sm:$0xff]  ;;  %v6640_v57 = vld [vmem:[#allocation5] ss:$0 sm:$0xff] }
  0x55   :  { %5165 = vmatprep.mubr.msk.f32.mxu1 %vm110_vm0, %v97_v2  ;;  %5175 = vmatprep.mubr.msk.f32.mxu0 %vm110_vm0, %v97_v2  ;;  %v6644_v59 = vld [vmem:[#allocation5 + $0x1] ss:$0 sm:$0xff]  ;;  %v6649_v12 = vld [vmem:[#allocation5 + $0x2] ss:$0 sm:$0xff] }
  0x56   :  { %5762 = vmatprep.subr.bf16.mxu1 %v6372_v23  ;;  %5768 = vmatprep.subr.bf16.mxu0 %v6372_v23 }
  0x57   :  { %5166 = vmatmul.mubr.msk.f32.vlgmr.msra.gmra.mrb[2].mxu1 %vm110_vm0, %v98_v10  ;;  %5176 = vmatmul.mubr.msk.f32.vlgmr.msra.gmra.mrb[2].mxu0 %vm110_vm0, %v98_v10 }
  0x58   :  { %5764 = vmatpush3.bf16.msra.mxu1 %v6543_v17  ;;  %5770 = vmatpush3.bf16.msra.mxu0 %v6545_v18 }
  0x59   :  { %5168 = vmatprep.mubr.msk.f32.mxu1 %vm110_vm0, %v99_v4  ;;  %5178 = vmatprep.mubr.msk.f32.mxu0 %vm110_vm0, %v99_v4 }
  0x5a   :  { %5765 = vmatprep.subr.bf16.mxu1 %v6372_v23  ;;  %5771 = vmatprep.subr.bf16.mxu0 %v6372_v23 }
  0x5b   :  { %5169 = vmatmul.mubr.msk.f32.gmra.mrb[4].mxu1 %vm110_vm0, %v100_v11  ;;  %5179 = vmatmul.mubr.msk.f32.gmra.mrb[4].mxu0 %vm110_vm0, %v100_v11 }
  0x5c   :  { %5767 = vmatpush3.bf16.msra.mxu1 %v6567_v24  ;;  %5773 = vmatpush3.bf16.msra.mxu0 %v6569_v25 }
  0x5d   :  { %5189 = vmatprep.mubr.msk.f32.mxu1 %vm6373_vm1, %v6374_v29  ;;  %5200 = vmatprep.mubr.msk.f32.mxu0 %vm6373_vm1, %v6374_v29 }
  0x5e   :  { %5774 = vmatprep.subr.bf16.mxu1 %v6372_v23  ;;  %5780 = vmatprep.subr.bf16.mxu0 %v6372_v23 }
  0x5f   :  { %5190 = vmatmul.mubr.f32.vlgmr.msra.gmra.mrb[6].mxu1 %v6374_v29  ;;  %5201 = vmatmul.mubr.f32.vlgmr.msra.gmra.mrb[6].mxu0 %v6374_v29 }
  0x60   :  { %5776 = vmatpush3.bf16.msra.mxu1 %v6585_v28  ;;  %5211 = vmatprep.mubr.msk.f32.mxu1 %vm6373_vm1, %v6374_v29 }
  0x61   :  { %5777 = vmatprep.subr.bf16.mxu1 %v6372_v23  ;;  %5782 = vmatpush3.bf16.msra.mxu0 %v6543_v17 }
  0x62   :  { %5783 = vmatprep.subr.bf16.mxu0 %v6372_v23  ;;  %5222 = vmatprep.mubr.msk.f32.mxu0 %vm6373_vm1, %v6374_v29 }
  0x64   :  { %5779 = vmatpush3.bf16.msra.mxu1 %v6602_v32 }
  0x65   :  { %5786 = vmatprep.subr.bf16.mxu1 %v6372_v23  ;;  %5785 = vmatpush3.bf16.msra.mxu0 %v6567_v24 }
  0x66   :  { %5792 = vmatprep.subr.bf16.mxu0 %v6372_v23 }
  0x67   :  { %5212 = vmatmul.mubr.f32.vlgmr.msra.gmra.mrb[8].mxu1 %v6374_v29 }
  0x68   :  { %5788 = vmatpush3.bf16.msra.mxu1 %v6545_v18  ;;  %5233 = vmatprep.mubr.msk.f32.mxu1 %vm6373_vm1, %v6374_v29 }
  0x69   :  { %5789 = vmatprep.subr.bf16.mxu1 %v6372_v23 }
  0x6c   :  { %5791 = vmatpush3.bf16.msra.mxu1 %v6569_v25 }
  0x6d   :  { %5798 = vmatprep.subr.bf16.mxu1 %v6372_v23 }
 0x126   :  { %v5160_v34 = vpop.f32.mrb[0].mxu1  ;;  %v5157_v35 = vpop.f32.mrb[0].mxu0 }
 0x127   :  { %v6622_v36 = vadd.f32 %v5160_v34, %v4739_v33  ;;  %v199_v37 = vpop.f32.mrb[1].mxu1  ;;  %v6624_v38 = vadd.f32 %v5157_v35, %v4739_v33  ;;  %v189_v39 = vpop.f32.mrb[1].mxu0 }
 0x128   :  { %v6626_v40 = vadd.f32 %v4739_v33, %v199_v37  ;;  %v6642_v58 = vadd.f32 %v4739_v33, %v189_v39 }
 0x12a   :  { %v5167_v43 = vpop.f32.mrb[2].mxu1  ;;  %v5177_v44 = vpop.f32.mrb[2].mxu0 }
 0x12b   :  { %v6628_v45 = vadd.f32 %v5167_v43, %v4746_v41  ;;  %v285_v46 = vpop.f32.mrb[3].mxu1  ;;  %v6630_v47 = vadd.f32 %v5177_v44, %v4753_v42  ;;  %v381_v48 = vpop.f32.mrb[3].mxu0 }
 0x12c   :  { %v286_v3 = vadd.f32 %v4746_v41, %v285_v46  ;;  %v382_v16 = vadd.f32 %v4753_v42, %v381_v48 }
 0x12e   :  { %v5170_v49 = vpop.f32.mrb[4].mxu1  ;;  %v5180_v50 = vpop.f32.mrb[4].mxu0 }
 0x12f   :  { %v6632_v51 = vadd.f32 %v5170_v49, %v4746_v41  ;;  %v295_v52 = vpop.f32.mrb[5].mxu1  ;;  %v6634_v53 = vadd.f32 %v5180_v50, %v4753_v42  ;;  %v391_v54 = vpop.f32.mrb[5].mxu0 }
 0x130   :  { %v6636_v55 = vadd.f32 %v4746_v41, %v295_v52  ;;  %v6638_v56 = vadd.f32 %v4753_v42, %v391_v54 }
 0x132   :  { %v495_v60 = vpop.f32.mrb[6].mxu1  ;;  %v571_v61 = vpop.f32.mrb[6].mxu0 }
 0x133   :  { %v496_v62 = vadd.f32 %v6640_v57, %v495_v60  ;;  %v5191_v63 = vpop.f32.mrb[7].mxu1  ;;  %v5202_v0 = vpop.f32.mrb[7].mxu0  ;;  %v572_v1 = vadd.f32 %v6644_v59, %v571_v61 }
 0x135   :  { %v651_v2 = vadd.f32 %v496_v62, %v6642_v58  ;;  %v658_v5 = vadd.f32 %v572_v1, %v286_v3 }
 0x137   :  { %v4769_v4 = vmul.f32 -1.442695, %v651_v2  ;;  %v4770_v8 = vmul.f32 -1.442695, %v658_v5 }
 0x139   :  { %6082 = vpow2.f32 %v4769_v4 }
 0x13a   :  { %v647_v6 = vpop.f32.mrb[8].mxu1  ;;  %6084 = vpow2.f32 %v4770_v8 }
 0x13b   :  { %v5213_v7 = vpop.f32.mrb[9].mxu1  ;;  %v648_v14 = vadd.f32 %v6649_v12, %v647_v6 }
 0x143   :  { %v6083_v9 = vpop.eup %6082 }
 0x144   :  { %v655_v10 = vadd.f32 1.0, %v6083_v9  ;;  %v6085_v11 = vpop.eup %6084 }
 0x145   :  { %v662_v13 = vadd.f32 1.0, %v6085_v11 }
 0x146   :  { %6086 = vrcp.f32 %v655_v10 }
 0x147   :  { %6088 = vrcp.f32 %v662_v13 }
 0x150   :  { %v6087_v15 = vpop.eup %6086 }
 0x151   :  { %v665_v19 = vmul.f32 %v6087_v15, %v648_v14  ;;  %v6089_v21 = vpop.eup %6088 }
 0x152   :  { %v668_v22 = vsub.f32 1.0, %v6089_v21  ;;  %v670_v30 = vmul.f32 0.0, %v6089_v21 }
 0x153   :  { %v666_v20 = vadd.f32 %v665_v19, %v382_v16 }
 0x155   :  { %6090 = vtanh.f32 %v666_v20 }
 0x15f   :  { %v6091_v26 = vpop.eup %6090 }
 0x160   :  { %v669_v27 = vmul.f32 %v6091_v26, %v668_v22 }
 0x162   :  { %v671_v31 = vadd.f32 %v670_v30, %v669_v27 }
 0x164   :  { %5223 = vmatmul.mubr.msk.f32.vlgmr.msra.gmra.mrb[8].mxu0 %vm425_vm2, %v671_v31  ;;  %5234 = vmatmul.mubr.msk.f32.vlgmr.msra.gmra.mrb[10].mxu1 %vm425_vm2, %v671_v31  ;;  %v913_v2 = vrot.slane %v671_v31, 4 }
 0x165   :  { %5794 = vmatpush3.bf16.msra.mxu0 %v6585_v28  ;;  %5244 = vmatprep.mubr.msk.f32.mxu0 %vm6373_vm1, %v6374_v29 }
 0x166   :  { %5795 = vmatprep.subr.bf16.mxu0 %v6372_v23  ;;  %5800 = vmatpush3.bf16.msra.mxu1 %v6543_v17 }
 0x167   :  { %5801 = vmatprep.subr.bf16.mxu1 %v6372_v23  ;;  %5255 = vmatprep.mubr.msk.f32.mxu1 %vm6373_vm1, %v6374_v29 }
 0x169   :  { %5797 = vmatpush3.bf16.msra.mxu0 %v6602_v32 }
 0x16a   :  { %5804 = vmatprep.subr.bf16.mxu0 %v6372_v23  ;;  %5803 = vmatpush3.bf16.msra.mxu1 %v6567_v24 }
 0x16b   :  { %5810 = vmatprep.subr.bf16.mxu1 %v6372_v23 }
 0x16c   :  { %5245 = vmatmul.mubr.msk.f32.vlgmr.msra.gmra.mrb[10].mxu0 %vm425_vm2, %v671_v31 }
 0x16d   :  { %5806 = vmatpush3.bf16.msra.mxu0 %v6545_v18  ;;  %5266 = vmatprep.mubr.msk.f32.mxu0 %vm6373_vm1, %v6374_v29 }
 0x16e   :  { %5807 = vmatprep.subr.bf16.mxu0 %v6372_v23 }
 0x171   :  { %5809 = vmatpush3.bf16.msra.mxu0 %v6569_v25 }
 0x172   :  { %5816 = vmatprep.subr.bf16.mxu0 %v6372_v23 }
 0x237   :  { %v741_v33 = vpop.f32.mrb[8].mxu0  ;;  %v811_v34 = vpop.f32.mrb[10].mxu1 }
 0x238   :  { %v742_v35 = vadd.f32 %v6640_v57, %v741_v33  ;;  %v812_v37 = vadd.f32 %v6644_v59, %v811_v34  ;;  %v5224_v39 = vpop.f32.mrb[9].mxu0  ;;  %v5235_v41 = vpop.f32.mrb[11].mxu1 }
 0x23a   :  { %v886_v42 = vrot.slane %v742_v35, 4  ;;  %v896_v43 = vrot.slane %v812_v37, 4 }
 0x23c   :  { %v888_v44 = vadd.f32 %v886_v42, %v6642_v58  ;;  %v898_v46 = vadd.f32 %v896_v43, %v286_v3 }
 0x23e   :  { %v4774_v48 = vmul.f32 -1.442695, %v888_v44  ;;  %v4775_v49 = vmul.f32 -1.442695, %v898_v46 }
 0x23f   :  { %v881_v50 = vpop.f32.mrb[10].mxu0 }
 0x240   :  { %6092 = vpow2.f32 %v4774_v48  ;;  %v5246_v52 = vpop.f32.mrb[11].mxu0  ;;  %v882_v63 = vadd.f32 %v6649_v12, %v881_v50 }
 0x241   :  { %6094 = vpow2.f32 %v4775_v49 }
 0x242   :  { %v906_v0 = vrot.slane %v882_v63, 4 }
 0x24a   :  { %v6093_v54 = vpop.eup %6092 }
 0x24b   :  { %v6095_v60 = vpop.eup %6094  ;;  %v892_v61 = vadd.f32 1.0, %v6093_v54 }
 0x24c   :  { %v902_v62 = vadd.f32 1.0, %v6095_v60 }
 0x24d   :  { %6096 = vrcp.f32 %v892_v61 }
 0x24e   :  { %6098 = vrcp.f32 %v902_v62 }
 0x257   :  { %v6097_v1 = vpop.eup %6096 }
 0x258   :  { %v6099_v4 = vpop.eup %6098  ;;  %v908_v58 = vmul.f32 %v6097_v1, %v906_v0 }
 0x259   :  { %v915_v3 = vmul.f32 %v6099_v4, %v913_v2  ;;  %v911_v6 = vsub.f32 1.0, %v6099_v4 }
 0x25a   :  { %v909_v5 = vadd.f32 %v908_v58, %v382_v16 }
 0x25c   :  { %6100 = vtanh.f32 %v909_v5 }
 0x266   :  { %v6101_v7 = vpop.eup %6100 }
 0x267   :  { %v912_v8 = vmul.f32 %v6101_v7, %v911_v6 }
 0x269   :  { %v916_v9 = vadd.f32 %v915_v3, %v912_v8 }
 0x26b   :  { %v918_v10 = vrot.slane %v916_v9, 4 }
 0x26d   :  { %5256 = vmatmul.mubr.msk.f32.vlgmr.msra.gmra.mrb[12].mxu1 %vm425_vm2, %v918_v10  ;;  %5267 = vmatmul.mubr.msk.f32.vlgmr.msra.gmra.mrb[12].mxu0 %vm425_vm2, %v918_v10 }
 0x26e   :  { %5812 = vmatpush3.bf16.msra.mxu1 %v6585_v28  ;;  %5277 = vmatprep.mubr.msk.f32.mxu1 %vm6373_vm1, %v6374_v29 }
 0x26f   :  { %5813 = vmatprep.subr.bf16.mxu1 %v6372_v23  ;;  %5818 = vmatpush3.bf16.msra.mxu0 %v6543_v17 }
 0x270   :  { %5819 = vmatprep.subr.bf16.mxu0 %v6372_v23  ;;  %5288 = vmatprep.mubr.msk.f32.mxu0 %vm6373_vm1, %v6374_v29 }
 0x272   :  { %5815 = vmatpush3.bf16.msra.mxu1 %v6602_v32 }
 0x273   :  { %5822 = vmatprep.subr.bf16.mxu1 %v6372_v23  ;;  %5821 = vmatpush3.bf16.msra.mxu0 %v6567_v24 }
 0x274   :  { %5828 = vmatprep.subr.bf16.mxu0 %v6372_v23 }
 0x275   :  { %5278 = vmatmul.mubr.msk.f32.vlgmr.msra.gmra.mrb[14].mxu1 %vm425_vm2, %v918_v10 }
 0x276   :  { %5824 = vmatpush3.bf16.msra.mxu1 %v6545_v18  ;;  %5299 = vmatprep.mubr.msk.f32.mxu1 %vm6373_vm1, %v6374_v29 }
 0x277   :  { %5825 = vmatprep.subr.bf16.mxu1 %v6372_v23 }
 0x27a   :  { %5827 = vmatpush3.bf16.msra.mxu1 %v6569_v25 }
 0x27b   :  { %5834 = vmatprep.subr.bf16.mxu1 %v6372_v23 }
 0x340   :  { %v987_v11 = vpop.f32.mrb[12].mxu1  ;;  %v1057_v13 = vpop.f32.mrb[12].mxu0 }
 0x341   :  { %v988_v14 = vadd.f32 %v6640_v57, %v987_v11  ;;  %v5257_v15 = vpop.f32.mrb[13].mxu1  ;;  %v5268_v16 = vpop.f32.mrb[13].mxu0  ;;  %v1058_v19 = vadd.f32 %v6644_v59, %v1057_v13 }
 0x343   :  { %v1131_v20 = vadd.f32 %v988_v14, %v6624_v38  ;;  %v1138_v22 = vadd.f32 %v1058_v19, %v6628_v45 }
 0x345   :  { %v4779_v21 = vmul.f32 -1.442695, %v1131_v20  ;;  %v4780_v30 = vmul.f32 -1.442695, %v1138_v22 }
 0x347   :  { %6102 = vpow2.f32 %v4779_v21 }
 0x348   :  { %v1127_v26 = vpop.f32.mrb[14].mxu1  ;;  %6104 = vpow2.f32 %v4780_v30 }
 0x349   :  { %v5279_v27 = vpop.f32.mrb[15].mxu1  ;;  %v1128_v37 = vadd.f32 %v6649_v12, %v1127_v26 }
 0x351   :  { %v6103_v31 = vpop.eup %6102 }
 0x352   :  { %v1135_v33 = vadd.f32 1.0, %v6103_v31  ;;  %v6105_v34 = vpop.eup %6104 }
 0x353   :  { %v1142_v35 = vadd.f32 1.0, %v6105_v34 }
 0x354   :  { %6106 = vrcp.f32 %v1135_v33 }
 0x355   :  { %6108 = vrcp.f32 %v1142_v35 }
 0x35e   :  { %v6107_v39 = vpop.eup %6106 }
 0x35f   :  { %v1145_v41 = vmul.f32 %v6107_v39, %v1128_v37  ;;  %v6109_v43 = vpop.eup %6108 }
 0x360   :  { %v1148_v44 = vsub.f32 1.0, %v6109_v43  ;;  %v1151_v49 = vmul.f32 %v6109_v43, %v918_v10 }
 0x361   :  { %v1146_v42 = vadd.f32 %v1145_v41, %v6630_v47 }
 0x363   :  { %6110 = vtanh.f32 %v1146_v42 }
 0x36d   :  { %v6111_v46 = vpop.eup %6110 }
 0x36e   :  { %v1149_v48 = vmul.f32 %v6111_v46, %v1148_v44 }
 0x370   :  { %v1152_v50 = vadd.f32 %v1151_v49, %v1149_v48 }
 0x372   :  { %5289 = vmatmul.mubr.msk.f32.vlgmr.msra.gmra.mrb[14].mxu0 %vm425_vm2, %v1152_v50  ;;  %5300 = vmatmul.mubr.msk.f32.vlgmr.msra.gmra.mrb[16].mxu1 %vm425_vm2, %v1152_v50  ;;  %v1394_v15 = vrot.slane %v1152_v50, 4 }
 0x373   :  { %5830 = vmatpush3.bf16.msra.mxu0 %v6585_v28  ;;  %5310 = vmatprep.mubr.msk.f32.mxu0 %vm6373_vm1, %v6374_v29 }
 0x374   :  { %5831 = vmatprep.subr.bf16.mxu0 %v6372_v23  ;;  %5836 = vmatpush3.bf16.msra.mxu1 %v6543_v17 }
 0x375   :  { %5837 = vmatprep.subr.bf16.mxu1 %v6372_v23  ;;  %5321 = vmatprep.mubr.msk.f32.mxu1 %vm6373_vm1, %v6374_v29 }
 0x377   :  { %5833 = vmatpush3.bf16.msra.mxu0 %v6602_v32 }
 0x378   :  { %5840 = vmatprep.subr.bf16.mxu0 %v6372_v23  ;;  %5839 = vmatpush3.bf16.msra.mxu1 %v6567_v24 }
 0x379   :  { %5846 = vmatprep.subr.bf16.mxu1 %v6372_v23 }
 0x37a   :  { %5311 = vmatmul.mubr.msk.f32.vlgmr.msra.gmra.mrb[16].mxu0 %vm425_vm2, %v1152_v50 }
 0x37b   :  { %5842 = vmatpush3.bf16.msra.mxu0 %v6545_v18  ;;  %5332 = vmatprep.mubr.msk.f32.mxu0 %vm6373_vm1, %v6374_v29 }
 0x37c   :  { %5843 = vmatprep.subr.bf16.mxu0 %v6372_v23 }
 0x37f   :  { %5845 = vmatpush3.bf16.msra.mxu0 %v6569_v25 }
 0x380   :  { %5852 = vmatprep.subr.bf16.mxu0 %v6372_v23 }
 0x445   :  { %v1222_v52 = vpop.f32.mrb[14].mxu0  ;;  %v1292_v54 = vpop.f32.mrb[16].mxu1 }
 0x446   :  { %v1223_v60 = vadd.f32 %v6640_v57, %v1222_v52  ;;  %v1293_v61 = vadd.f32 %v6644_v59, %v1292_v54  ;;  %v5290_v62 = vpop.f32.mrb[15].mxu0  ;;  %v5301_v63 = vpop.f32.mrb[17].mxu1 }
 0x448   :  { %v1367_v0 = vrot.slane %v1223_v60, 4  ;;  %v1377_v1 = vrot.slane %v1293_v61, 4 }
 0x44a   :  { %v1369_v2 = vadd.f32 %v1367_v0, %v6624_v38  ;;  %v1379_v4 = vadd.f32 %v1377_v1, %v6628_v45 }
 0x44c   :  { %v4784_v58 = vmul.f32 -1.442695, %v1369_v2  ;;  %v4785_v3 = vmul.f32 -1.442695, %v1379_v4 }
 0x44d   :  { %v1362_v5 = vpop.f32.mrb[16].mxu0 }
 0x44e   :  { %6112 = vpow2.f32 %v4784_v58  ;;  %v5312_v6 = vpop.f32.mrb[17].mxu0  ;;  %v1363_v11 = vadd.f32 %v6649_v12, %v1362_v5 }
 0x44f   :  { %6114 = vpow2.f32 %v4785_v3 }
 0x450   :  { %v1387_v13 = vrot.slane %v1363_v11, 4 }
 0x458   :  { %v6113_v7 = vpop.eup %6112 }
 0x459   :  { %v6115_v8 = vpop.eup %6114  ;;  %v1373_v9 = vadd.f32 1.0, %v6113_v7 }
 0x45a   :  { %v1383_v10 = vadd.f32 1.0, %v6115_v8 }
 0x45b   :  { %6116 = vrcp.f32 %v1373_v9 }
 0x45c   :  { %6118 = vrcp.f32 %v1383_v10 }
 0x465   :  { %v6117_v14 = vpop.eup %6116 }
 0x466   :  { %v6119_v38 = vpop.eup %6118  ;;  %v1389_v16 = vmul.f32 %v6117_v14, %v1387_v13 }
 0x467   :  { %v1396_v45 = vmul.f32 %v6119_v38, %v1394_v15  ;;  %v1392_v20 = vsub.f32 1.0, %v6119_v38 }
 0x468   :  { %v1390_v19 = vadd.f32 %v1389_v16, %v6630_v47 }
 0x46a   :  { %6120 = vtanh.f32 %v1390_v19 }
 0x474   :  { %v6121_v21 = vpop.eup %6120 }
 0x475   :  { %v1393_v22 = vmul.f32 %v6121_v21, %v1392_v20 }
 0x477   :  { %v1397_v26 = vadd.f32 %v1396_v45, %v1393_v22 }
 0x479   :  { %v1399_v27 = vrot.slane %v1397_v26, 4 }
 0x47b   :  { %5322 = vmatmul.mubr.msk.f32.vlgmr.msra.gmra.mrb[18].mxu1 %vm425_vm2, %v1399_v27  ;;  %5333 = vmatmul.mubr.msk.f32.vlgmr.msra.gmra.mrb[18].mxu0 %vm425_vm2, %v1399_v27 }
 0x47c   :  { %5848 = vmatpush3.bf16.msra.mxu1 %v6585_v28  ;;  %5343 = vmatprep.mubr.msk.f32.mxu1 %vm6373_vm1, %v6374_v29 }
 0x47d   :  { %5849 = vmatprep.subr.bf16.mxu1 %v6372_v23  ;;  %5854 = vmatpush3.bf16.msra.mxu0 %v6543_v17 }
 0x47e   :  { %5855 = vmatprep.subr.bf16.mxu0 %v6372_v23  ;;  %5354 = vmatprep.mubr.msk.f32.mxu0 %vm6373_vm1, %v6374_v29 }
 0x480   :  { %5851 = vmatpush3.bf16.msra.mxu1 %v6602_v32 }
 0x481   :  { %5858 = vmatprep.subr.bf16.mxu1 %v6372_v23  ;;  %5857 = vmatpush3.bf16.msra.mxu0 %v6567_v24 }
 0x482   :  { %5864 = vmatprep.subr.bf16.mxu0 %v6372_v23 }
 0x483   :  { %5344 = vmatmul.mubr.msk.f32.vlgmr.msra.gmra.mrb[20].mxu1 %vm425_vm2, %v1399_v27 }
 0x484   :  { %5860 = vmatpush3.bf16.msra.mxu1 %v6545_v18  ;;  %5365 = vmatprep.mubr.msk.f32.mxu1 %vm6373_vm1, %v6374_v29 }
 0x485   :  { %5861 = vmatprep.subr.bf16.mxu1 %v6372_v23 }
 0x488   :  { %5863 = vmatpush3.bf16.msra.mxu1 %v6569_v25 }
 0x489   :  { %5870 = vmatprep.subr.bf16.mxu1 %v6372_v23 }
 0x54e   :  { %v1468_v47 = vpop.f32.mrb[18].mxu1  ;;  %v1538_v30 = vpop.f32.mrb[18].mxu0 }
 0x54f   :  { %v1469_v31 = vadd.f32 %v6640_v57, %v1468_v47  ;;  %v5323_v33 = vpop.f32.mrb[19].mxu1  ;;  %v5334_v34 = vpop.f32.mrb[19].mxu0  ;;  %v1539_v35 = vadd.f32 %v6644_v59, %v1538_v30 }
 0x551   :  { %v1612_v37 = vadd.f32 %v1469_v31, %v6626_v40  ;;  %v1619_v41 = vadd.f32 %v1539_v35, %v6636_v55 }
 0x553   :  { %v4789_v39 = vmul.f32 -1.442695, %v1612_v37  ;;  %v4790_v44 = vmul.f32 -1.442695, %v1619_v41 }
 0x555   :  { %6122 = vpow2.f32 %v4789_v39 }
 0x556   :  { %v1608_v42 = vpop.f32.mrb[20].mxu1  ;;  %6124 = vpow2.f32 %v4790_v44 }
 0x557   :  { %v5345_v43 = vpop.f32.mrb[21].mxu1  ;;  %v1609_v52 = vadd.f32 %v6649_v12, %v1608_v42 }
 0x55f   :  { %v6123_v46 = vpop.eup %6122 }
 0x560   :  { %v1616_v48 = vadd.f32 1.0, %v6123_v46  ;;  %v6125_v49 = vpop.eup %6124 }
 0x561   :  { %v1623_v50 = vadd.f32 1.0, %v6125_v49 }
 0x562   :  { %6126 = vrcp.f32 %v1616_v48 }
 0x563   :  { %6128 = vrcp.f32 %v1623_v50 }
 0x56c   :  { %v6127_v54 = vpop.eup %6126 }
 0x56d   :  { %v1626_v60 = vmul.f32 %v6127_v54, %v1609_v52  ;;  %v6129_v62 = vpop.eup %6128 }
 0x56e   :  { %v1629_v63 = vsub.f32 1.0, %v6129_v62  ;;  %v1632_v2 = vmul.f32 %v6129_v62, %v1399_v27 }
 0x56f   :  { %v1627_v61 = vadd.f32 %v1626_v60, %v6638_v56 }
 0x571   :  { %6130 = vtanh.f32 %v1627_v61 }
 0x57b   :  { %v6131_v0 = vpop.eup %6130 }
 0x57c   :  { %v1630_v1 = vmul.f32 %v6131_v0, %v1629_v63 }
 0x57e   :  { %v1633_v4 = vadd.f32 %v1632_v2, %v1630_v1 }
 0x580   :  { %5355 = vmatmul.mubr.msk.f32.vlgmr.msra.gmra.mrb[20].mxu0 %vm425_vm2, %v1633_v4  ;;  %5366 = vmatmul.mubr.msk.f32.vlgmr.msra.gmra.mrb[22].mxu1 %vm425_vm2, %v1633_v4  ;;  %v1875_v47 = vrot.slane %v1633_v4, 4 }
 0x581   :  { %5866 = vmatpush3.bf16.msra.mxu0 %v6585_v28  ;;  %5376 = vmatprep.mubr.msk.f32.mxu0 %vm6373_vm1, %v6374_v29 }
 0x582   :  { %5867 = vmatprep.subr.bf16.mxu0 %v6372_v23  ;;  %5872 = vmatpush3.bf16.msra.mxu1 %v6543_v17 }
 0x583   :  { %5873 = vmatprep.subr.bf16.mxu1 %v6372_v23  ;;  %5387 = vmatprep.mubr.msk.f32.mxu1 %vm6373_vm1, %v6374_v29 }
 0x585   :  { %5869 = vmatpush3.bf16.msra.mxu0 %v6602_v32 }
 0x586   :  { %5876 = vmatprep.subr.bf16.mxu0 %v6372_v23  ;;  %5875 = vmatpush3.bf16.msra.mxu1 %v6567_v24 }
 0x587   :  { %5882 = vmatprep.subr.bf16.mxu1 %v6372_v23 }
 0x588   :  { %5377 = vmatmul.mubr.msk.f32.vlgmr.msra.gmra.mrb[22].mxu0 %vm425_vm2, %v1633_v4 }
 0x589   :  { %5878 = vmatpush3.bf16.msra.mxu0 %v6545_v18  ;;  %5398 = vmatprep.mubr.msk.f32.mxu0 %vm6373_vm1, %v6374_v29 }
 0x58a   :  { %5879 = vmatprep.subr.bf16.mxu0 %v6372_v23 }
 0x58d   :  { %5881 = vmatpush3.bf16.msra.mxu0 %v6569_v25 }
 0x58e   :  { %5888 = vmatprep.subr.bf16.mxu0 %v6372_v23 }
 0x653   :  { %v1703_v58 = vpop.f32.mrb[20].mxu0  ;;  %v1773_v3 = vpop.f32.mrb[22].mxu1 }
 0x654   :  { %v1704_v5 = vadd.f32 %v6640_v57, %v1703_v58  ;;  %v1774_v6 = vadd.f32 %v6644_v59, %v1773_v3  ;;  %v5356_v7 = vpop.f32.mrb[21].mxu0  ;;  %v5367_v8 = vpop.f32.mrb[23].mxu1 }
 0x655   :  { %v2365_v7 = vld [vmem:[#allocation7 + $0x8] sm:$0xff] }
 0x656   :  { %v1848_v9 = vrot.slane %v1704_v5, 4  ;;  %v1858_v10 = vrot.slane %v1774_v6, 4  ;;  %v2364_v6 = vld [vmem:[#allocation7] sm:$0xff] }
 0x657   :  { %v5906_v8 = vpack.c.bf16 %v2365_v7, %v2364_v6  ;;  %v2675_v6 = vld [vmem:[#allocation8 + $0x58] sm:$0xff] }
 0x658   :  { %v1850_v11 = vadd.f32 %v1848_v9, %v6626_v40  ;;  %v1860_v13 = vadd.f32 %v1858_v10, %v6636_v55  ;;  %v2360_v9 = vld [vmem:[%s7161_s1] sm:$0xff] }
 0x659   :  { %v2472_v10 = vld [vmem:[#allocation7 + $0x18] sm:$0xff] }
 0x65a   :  { %v4794_v14 = vmul.f32 -1.442695, %v1850_v11  ;;  %v4795_v15 = vmul.f32 -1.442695, %v1860_v13  ;;  %v2567_v13 = vld [vmem:[#allocation7 + $0x20] sm:$0xff] }
 0x65b   :  { %v1843_v38 = vpop.f32.mrb[22].mxu0 }
 0x65c   :  { %6132 = vpow2.f32 %v4794_v14  ;;  %v5378_v16 = vpop.f32.mrb[23].mxu0  ;;  %v1844_v22 = vadd.f32 %v6649_v12, %v1843_v38  ;;  %v2568_v14 = vld [vmem:[#allocation7 + $0x28] sm:$0xff] }
 0x65d   :  { %6134 = vpow2.f32 %v4795_v15  ;;  %v2362_v15 = vld [vmem:[%s7161_s1 + $0x10] sm:$0xff]  ;;  %v5914_v38 = vpack.c.bf16 %v2568_v14, %v2567_v13  ;;  %v2363_v16 = vld [vmem:[%s7161_s1 + $0x18] sm:$0xff] }
 0x65e   :  { %v1868_v26 = vrot.slane %v1844_v22, 4  ;;  %v2668_v22 = vld [vmem:[#allocation8 + $0x28] sm:$0xff] }
 0x666   :  { %v6133_v45 = vpop.eup %6132 }
 0x667   :  { %v6135_v19 = vpop.eup %6134  ;;  %v1854_v20 = vadd.f32 1.0, %v6133_v45  ;;  %v2662_v45 = vld [vmem:[#allocation8] sm:$0xff] }
 0x668   :  { %v1864_v21 = vadd.f32 1.0, %v6135_v19  ;;  %v2663_v19 = vld [vmem:[#allocation8 + $0x8] sm:$0xff] }
 0x669   :  { %6136 = vrcp.f32 %v1854_v20  ;;  %v6843_v20 = vpack.c.bf16 %v2663_v19, %v2662_v45 }
 0x66a   :  { %6138 = vrcp.f32 %v1864_v21  ;;  %v2667_v21 = vld [vmem:[#allocation8 + $0x20] sm:$0xff] }
 0x673   :  { %v6137_v27 = vpop.eup %6136 }
 0x674   :  { %v6139_v40 = vpop.eup %6138  ;;  %v1870_v30 = vmul.f32 %v6137_v27, %v1868_v26  ;;  %v6847_v26 = vpack.c.bf16 %v2668_v22, %v2667_v21  ;;  %v2664_v27 = vld [vmem:[#allocation8 + $0x10] sm:$0xff] }
 0x675   :  { %v1877_v55 = vmul.f32 %v6139_v40, %v1875_v47  ;;  %v1873_v33 = vsub.f32 1.0, %v6139_v40  ;;  %v2665_v47 = vld [vmem:[#allocation8 + $0x18] sm:$0xff]  ;;  %v2669_v40 = vld [vmem:[#allocation8 + $0x30] sm:$0xff] }
 0x676   :  { %v1871_v31 = vadd.f32 %v1870_v30, %v6638_v56  ;;  %v6855_v30 = vpack.c.bf16 %v2665_v47, %v2664_v27 }
 0x678   :  { %6140 = vtanh.f32 %v1871_v31 }
 0x682   :  { %v6141_v34 = vpop.eup %6140 }
 0x683   :  { %v1874_v35 = vmul.f32 %v6141_v34, %v1873_v33 }
 0x685   :  { %v1878_v37 = vadd.f32 %v1877_v55, %v1874_v35  ;;  %v2670_v55 = vld [vmem:[#allocation8 + $0x38] sm:$0xff] }
 0x686   :  { %v6859_v31 = vpack.c.bf16 %v2670_v55, %v2669_v40 }
 0x687   :  { %v1880_v39 = vrot.slane %v1878_v37, 4 }
 0x689   :  { %5388 = vmatmul.mubr.msk.f32.vlgmr.msra.gmra.mrb[24].mxu1 %vm425_vm2, %v1880_v39  ;;  %5399 = vmatmul.mubr.msk.f32.vlgmr.msra.gmra.mrb[24].mxu0 %vm425_vm2, %v1880_v39 }
 0x68a   :  { %5884 = vmatpush3.bf16.msra.mxu1 %v6585_v28  ;;  %5409 = vmatprep.mubr.msk.f32.mxu1 %vm6373_vm1, %v6374_v29 }
 0x68b   :  { %5885 = vmatprep.subr.bf16.mxu1 %v6372_v23  ;;  %5890 = vmatpush3.bf16.msra.mxu0 %v6543_v17 }
 0x68c   :  { %5891 = vmatprep.subr.bf16.mxu0 %v6372_v23  ;;  %5420 = vmatprep.mubr.msk.f32.mxu0 %vm6373_vm1, %v6374_v29 }
 0x68e   :  { %5887 = vmatpush3.bf16.msra.mxu1 %v6602_v32 }
 0x68f   :  { %5894 = vmatprep.subr.bf16.mxu1 %v6372_v23  ;;  %5893 = vmatpush3.bf16.msra.mxu0 %v6567_v24 }
 0x690   :  { %5900 = vmatprep.subr.bf16.mxu0 %v6372_v23 }
 0x691   :  { %5410 = vmatmul.mubr.msk.f32.vlgmr.msra.gmra.mrb[26].mxu1 %vm425_vm2, %v1880_v39 }
 0x692   :  { %5896 = vmatpush3.bf16.msra.mxu1 %v6545_v18  ;;  %5431 = vmatprep.mubr.msk.f32.mxu1 %vm6373_vm1, %v6374_v29 }
 0x693   :  { %5897 = vmatprep.subr.bf16.mxu1 %v6372_v23 }
 0x696   :  { %5899 = vmatpush3.bf16.msra.mxu1 %v6569_v25 }
 0x697   :  { %5907 = vmatprep.subr.bf16.mxu1 %v5906_v8 }
 0x75c   :  { %v1949_v17 = vpop.f32.mrb[24].mxu1  ;;  %v2019_v56 = vpop.f32.mrb[24].mxu0 }
 0x75d   :  { %v1950_v41 = vadd.f32 %v6640_v57, %v1949_v17  ;;  %v5389_v42 = vpop.f32.mrb[25].mxu1  ;;  %v5400_v43 = vpop.f32.mrb[25].mxu0  ;;  %v2020_v24 = vadd.f32 %v6644_v59, %v2019_v56 }
 0x75f   :  { %v2093_v44 = vadd.f32 %v1950_v41, %v6622_v36  ;;  %v2100_v18 = vadd.f32 %v2020_v24, %v6632_v51 }
 0x761   :  { %v4799_v46 = vmul.f32 -1.442695, %v2093_v44  ;;  %v4800_v50 = vmul.f32 -1.442695, %v2100_v18 }
 0x763   :  { %6142 = vpow2.f32 %v4799_v46 }
 0x764   :  { %v2089_v48 = vpop.f32.mrb[26].mxu1  ;;  %6144 = vpow2.f32 %v4800_v50 }
 0x765   :  { %v5411_v49 = vpop.f32.mrb[27].mxu1  ;;  %v2090_v61 = vadd.f32 %v6649_v12, %v2089_v48 }
 0x76d   :  { %v6143_v52 = vpop.eup %6142 }
 0x76e   :  { %v2097_v25 = vadd.f32 1.0, %v6143_v52  ;;  %v6145_v54 = vpop.eup %6144 }
 0x76f   :  { %v2104_v60 = vadd.f32 1.0, %v6145_v54 }
 0x770   :  { %6146 = vrcp.f32 %v2097_v25 }
 0x771   :  { %6148 = vrcp.f32 %v2104_v60 }
 0x77a   :  { %v6147_v62 = vpop.eup %6146 }
 0x77b   :  { %v2107_v63 = vmul.f32 %v6147_v62, %v2090_v61  ;;  %v6149_v1 = vpop.eup %6148 }
 0x77c   :  { %v2110_v2 = vsub.f32 1.0, %v6149_v1  ;;  %v2113_v3 = vmul.f32 %v6149_v1, %v1880_v39  ;;  %v2672_v1 = vld [vmem:[#allocation8 + $0x40] sm:$0xff] }
 0x77d   :  { %v2108_v0 = vadd.f32 %v2107_v63, %v6634_v53 }
 0x77f   :  { %6150 = vtanh.f32 %v2108_v0 }
 0x789   :  { %v6151_v4 = vpop.eup %6150 }
 0x78a   :  { %v2111_v58 = vmul.f32 %v6151_v4, %v2110_v2  ;;  %v2673_v2 = vld [vmem:[#allocation8 + $0x48] sm:$0xff] }
 0x78c   :  { %v6811_v5 = vadd.f32 %v2113_v3, %v2111_v58  ;;  %v6877_v58 = vpack.c.bf16 %v2673_v2, %v2672_v1 }
 0x78e   :  { %5421 = vmatmul.mubr.msk.f32.vlgmr.msra.gmra.mrb[26].mxu0 %vm425_vm2, %v6811_v5  ;;  %5432 = vmatmul.mubr.msk.f32.vlgmr.msra.gmra.mrb[28].mxu1 %vm425_vm2, %v6811_v5 }
 0x78f   :  { %5902 = vmatpush3.bf16.msra.mxu0 %v6585_v28  ;;  %5442 = vmatprep.mubr.msk.f32.mxu0 %vm6373_vm1, %v6374_v29  ;;  %v2361_v28 = vld [vmem:[%s7161_s1 + $0x8] sm:$0xff] }
 0x790   :  { %5903 = vmatprep.subr.bf16.mxu0 %v6372_v23  ;;  %5909 = vmatpush3.bf16.msra.mxu1 %v5906_v8 }
 0x791   :  { %5449 = vmatprep.mubr.msk.f32.mxu1 %vm110_vm0, %v2360_v9  ;;  %5915 = vmatprep.subr.bf16.mxu1 %v5914_v38 }
 0x793   :  { %5905 = vmatpush3.bf16.msra.mxu0 %v6602_v32  ;;  %5450 = vmatmul.mubr.msk.f32.vlgmr.msra.gmra.mrb[30].mxu1 %vm110_vm0, %v2361_v28  ;;  %v2471_v32 = vld [vmem:[#allocation7 + $0x10] sm:$0xff] }
 0x794   :  { %v5910_v11 = vpack.c.bf16 %v2472_v10, %v2471_v32  ;;  %5452 = vmatprep.mubr.msk.f32.mxu1 %vm110_vm0, %v2362_v15  ;;  %5917 = vmatpush3.bf16.msra.mxu1 %v5914_v38  ;;  %v4812_v32 = vld [vmem:[%s7168_s8 + $0x1] ss:$0 sm:$0xff] }
 0x795   :  { %5924 = vmatprep.subr.bf16.mxu1 %v6372_v23 }
 0x796   :  { %5443 = vmatmul.mubr.msk.f32.vlgmr.msra.gmra.mrb[28].mxu0 %vm425_vm2, %v6811_v5  ;;  %5911 = vmatprep.subr.bf16.mxu0 %v5910_v11 }
 0x797   :  { %5459 = vmatprep.mubr.msk.f32.mxu0 %vm110_vm0, %v2360_v9  ;;  %5453 = vmatmul.mubr.msk.f32.gmra.mrb[32].mxu1 %vm110_vm0, %v2363_v16 }
 0x798   :  { %5913 = vmatpush3.bf16.msra.mxu0 %v5910_v11  ;;  %5469 = vmatprep.mubr.msk.f32.mxu1 %vm110_vm0, %v2360_v9 }
 0x799   :  { %5918 = vmatprep.subr.bf16.mxu0 %v6372_v23 }
 0x79b   :  { %5460 = vmatmul.mubr.msk.f32.vlgmr.msra.gmra.mrb[30].mxu0 %vm110_vm0, %v2361_v28  ;;  %5470 = vmatmul.mubr.msk.f32.vlgmr.msra.gmra.mrb[34].mxu1 %vm110_vm0, %v2361_v28 }
 0x79c   :  { %5920 = vmatpush3.bf16.msra.mxu0 %v6843_v20  ;;  %5462 = vmatprep.mubr.msk.f32.mxu0 %vm110_vm0, %v2362_v15 }
 0x79d   :  { %5921 = vmatprep.subr.bf16.mxu0 %v6372_v23  ;;  %5926 = vmatpush3.bf16.msra.mxu1 %v6847_v26 }
 0x79e   :  { %5472 = vmatprep.mubr.msk.f32.mxu1 %vm110_vm0, %v2362_v15  ;;  %5927 = vmatprep.subr.bf16.mxu1 %v6372_v23  ;;  %v4818_v15 = vld [vmem:[%s7168_s8 + $0x2] ss:$0 sm:$0xff] }
 0x79f   :  { %5463 = vmatmul.mubr.msk.f32.gmra.mrb[32].mxu0 %vm110_vm0, %v2363_v16  ;;  %5473 = vmatmul.mubr.msk.f32.gmra.mrb[36].mxu1 %vm110_vm0, %v2363_v16 }
 0x7a0   :  { %5923 = vmatpush3.bf16.msra.mxu0 %v6855_v30  ;;  %5483 = vmatprep.mubr.msk.f32.mxu0 %vm6373_vm1, %v6374_v29 }
 0x7a1   :  { %5930 = vmatprep.subr.bf16.mxu0 %v6372_v23  ;;  %5929 = vmatpush3.bf16.msra.mxu1 %v6859_v31 }
 0x7a2   :  { %5494 = vmatprep.mubr.msk.f32.mxu1 %vm6373_vm1, %v6374_v29  ;;  %5936 = vmatprep.subr.bf16.mxu1 %v6372_v23 }
 0x861   :  { %v2184_v33 = vpop.f32.mrb[26].mxu0  ;;  %v2254_v34 = vpop.f32.mrb[28].mxu1 }
 0x862   :  { %v2185_v35 = vadd.f32 %v6640_v57, %v2184_v33  ;;  %v2255_v37 = vadd.f32 %v6644_v59, %v2254_v34  ;;  %v5422_v39 = vpop.f32.mrb[27].mxu0  ;;  %v5433_v17 = vpop.f32.mrb[29].mxu1 }
 0x863   :  { %v6942_v39 = vld [vmem:[%s7169_s9 + $0x1] ss:$0 sm:$0xff] }
 0x864   :  { %v2329_v56 = vrot.slane %v2185_v35, 4  ;;  %v2339_v41 = vrot.slane %v2255_v37, 4  ;;  %v6937_v37 = vld [vmem:[%s7169_s9] ss:$0 sm:$0xff] }
 0x866   :  { %v2331_v42 = vadd.f32 %v2329_v56, %v6622_v36  ;;  %v2341_v43 = vadd.f32 %v2339_v41, %v6632_v51  ;;  %v2356_v36 = vrot.slane %v6811_v5, 4  ;;  %v4806_v5 = vld [vmem:[%s7168_s8] ss:$0 sm:$0xff]  ;;  %v5451_v7 = vpop.f32.mrb[30].mxu1 }
 0x867   :  { %v6910_v8 = vadd.f32 %v5451_v7, %v4806_v5  ;;  %v2451_v9 = vpop.f32.mrb[31].mxu1 }
 0x868   :  { %v4804_v24 = vmul.f32 -1.442695, %v2331_v42  ;;  %v4805_v44 = vmul.f32 -1.442695, %v2341_v43  ;;  %v2452_v41 = vadd.f32 %v4806_v5, %v2451_v9 }
 0x869   :  { %v2324_v46 = vpop.f32.mrb[28].mxu0 }
 0x86a   :  { %6152 = vpow2.f32 %v4804_v24  ;;  %v5444_v18 = vpop.f32.mrb[29].mxu0  ;;  %v2325_v59 = vadd.f32 %v6649_v12, %v2324_v46  ;;  %v2674_v12 = vld [vmem:[#allocation8 + $0x50] sm:$0xff]  ;;  %v5454_v28 = vpop.f32.mrb[32].mxu1 }
 0x86b   :  { %6154 = vpow2.f32 %v4805_v44  ;;  %v6915_v10 = vadd.f32 %v5454_v28, %v4806_v5  ;;  %v2461_v11 = vpop.f32.mrb[33].mxu1 }
 0x86c   :  { %v2349_v52 = vrot.slane %v2325_v59, 4  ;;  %v6917_v13 = vadd.f32 %v4806_v5, %v2461_v11 }
 0x86e   :  { %v5461_v14 = vpop.f32.mrb[30].mxu0  ;;  %v5471_v45 = vpop.f32.mrb[34].mxu1 }
 0x86f   :  { %v6922_v38 = vadd.f32 %v5461_v14, %v4812_v32  ;;  %v2547_v16 = vpop.f32.mrb[31].mxu0  ;;  %v6924_v19 = vadd.f32 %v5471_v45, %v4818_v15  ;;  %v2643_v21 = vpop.f32.mrb[35].mxu1 }
 0x870   :  { %v2548_v18 = vadd.f32 %v4812_v32, %v2547_v16 }
 0x872   :  { %v5464_v22 = vpop.f32.mrb[32].mxu0  ;;  %v5474_v55 = vpop.f32.mrb[36].mxu1 }
 0x873   :  { %v6926_v27 = vadd.f32 %v5464_v22, %v4812_v32  ;;  %v2557_v47 = vpop.f32.mrb[33].mxu0  ;;  %v6930_v33 = vadd.f32 %v5474_v55, %v4818_v15  ;;  %v2653_v34 = vpop.f32.mrb[37].mxu1 }
 0x874   :  { %v6153_v48 = vpop.eup %6152  ;;  %v6928_v40 = vadd.f32 %v4812_v32, %v2557_v47  ;;  %v6932_v35 = vadd.f32 %v4818_v15, %v2653_v34 }
 0x875   :  { %v6155_v49 = vpop.eup %6154  ;;  %v2335_v50 = vadd.f32 1.0, %v6153_v48 }
 0x876   :  { %v2345_v57 = vadd.f32 1.0, %v6155_v49 }
 0x877   :  { %6156 = vrcp.f32 %v2335_v50 }
 0x878   :  { %6158 = vrcp.f32 %v2345_v57 }
 0x881   :  { %v6157_v25 = vpop.eup %6156 }
 0x882   :  { %v6159_v54 = vpop.eup %6158  ;;  %v2351_v51 = vmul.f32 %v6157_v25, %v2349_v52 }
 0x883   :  { %v2358_v60 = vmul.f32 %v6159_v54, %v2356_v36  ;;  %v2354_v62 = vsub.f32 1.0, %v6159_v54  ;;  %v6949_v54 = vld [vmem:[%s7169_s9 + $0x2] ss:$0 sm:$0xff] }
 0x884   :  { %v2352_v61 = vadd.f32 %v2351_v51, %v6634_v53  ;;  %v6886_v53 = vpack.c.bf16 %v2675_v6, %v2674_v12 }
 0x886   :  { %6160 = vtanh.f32 %v2352_v61 }
 0x890   :  { %v6161_v63 = vpop.eup %6160 }
 0x891   :  { %v2355_v0 = vmul.f32 %v6161_v63, %v2354_v62  ;;  %v2644_v62 = vadd.f32 %v4818_v15, %v2643_v21 }
 0x893   :  { %v2359_v4 = vadd.f32 %v2358_v60, %v2355_v0 }
 0x895   :  { %v6879_v3 = vrot.slane %v2359_v4, 4 }
 0x897   :  { %5484 = vmatmul.mubr.msk.f32.vlgmr.msra.gmra.mrb[34].mxu0 %vm425_vm2, %v6879_v3  ;;  %5495 = vmatmul.mubr.msk.f32.vlgmr.msra.gmra.mrb[38].mxu1 %vm425_vm2, %v6879_v3 }
 0x898   :  { %5932 = vmatpush3.bf16.msra.mxu0 %v6877_v58  ;;  %5505 = vmatprep.mubr.msk.f32.mxu0 %vm6373_vm1, %v6374_v29 }
 0x899   :  { %5933 = vmatprep.subr.bf16.mxu0 %v6372_v23  ;;  %5938 = vmatpush3.bf16.msra.mxu1 %v6843_v20 }
 0x89a   :  { %5939 = vmatprep.subr.bf16.mxu1 %v6372_v23  ;;  %5516 = vmatprep.mubr.msk.f32.mxu1 %vm6373_vm1, %v6374_v29 }
 0x89c   :  { %5935 = vmatpush3.bf16.msra.mxu0 %v6886_v53 }
 0x89d   :  { %5942 = vmatprep.subr.bf16.mxu0 %v6372_v23  ;;  %5941 = vmatpush3.bf16.msra.mxu1 %v6855_v30 }
 0x89e   :  { %5948 = vmatprep.subr.bf16.mxu1 %v6372_v23 }
 0x89f   :  { %5506 = vmatmul.mubr.msk.f32.vlgmr.msra.gmra.mrb[36].mxu0 %vm425_vm2, %v6879_v3 }
 0x8a0   :  { %5944 = vmatpush3.bf16.msra.mxu0 %v6847_v26  ;;  %5527 = vmatprep.mubr.msk.f32.mxu0 %vm6373_vm1, %v6374_v29 }
 0x8a1   :  { %5945 = vmatprep.subr.bf16.mxu0 %v6372_v23 }
 0x8a4   :  { %5947 = vmatpush3.bf16.msra.mxu0 %v6859_v31 }
 0x8a5   :  { %5954 = vmatprep.subr.bf16.mxu0 %v6372_v23 }
 0x96a   :  { %v2757_v17 = vpop.f32.mrb[34].mxu0  ;;  %v2833_v56 = vpop.f32.mrb[38].mxu1 }
 0x96b   :  { %v2758_v42 = vadd.f32 %v6937_v37, %v2757_v17  ;;  %v5485_v43 = vpop.f32.mrb[35].mxu0  ;;  %v5496_v24 = vpop.f32.mrb[39].mxu1  ;;  %v2834_v44 = vadd.f32 %v6942_v39, %v2833_v56 }
 0x96d   :  { %v2913_v46 = vadd.f32 %v2758_v42, %v2452_v41  ;;  %v2920_v49 = vadd.f32 %v2834_v44, %v2548_v18 }
 0x96f   :  { %v4831_v48 = vmul.f32 -1.442695, %v2913_v46  ;;  %v4832_v59 = vmul.f32 -1.442695, %v2920_v49 }
 0x971   :  { %6162 = vpow2.f32 %v4831_v48 }
 0x972   :  { %v2909_v50 = vpop.f32.mrb[36].mxu0  ;;  %6164 = vpow2.f32 %v4832_v59 }
 0x973   :  { %v5507_v57 = vpop.f32.mrb[37].mxu0  ;;  %v2910_v60 = vadd.f32 %v6949_v54, %v2909_v50 }
 0x97b   :  { %v6163_v52 = vpop.eup %6162 }
 0x97c   :  { %v2917_v25 = vadd.f32 1.0, %v6163_v52  ;;  %v6165_v36 = vpop.eup %6164 }
 0x97d   :  { %v2924_v51 = vadd.f32 1.0, %v6165_v36 }
 0x97e   :  { %6166 = vrcp.f32 %v2917_v25 }
 0x97f   :  { %6168 = vrcp.f32 %v2924_v51 }
 0x988   :  { %v6167_v61 = vpop.eup %6166 }
 0x989   :  { %v2927_v63 = vmul.f32 %v6167_v61, %v2910_v60  ;;  %v6169_v1 = vpop.eup %6168 }
 0x98a   :  { %v2930_v2 = vsub.f32 1.0, %v6169_v1  ;;  %v2933_v6 = vmul.f32 %v6169_v1, %v6879_v3 }
 0x98b   :  { %v2928_v0 = vadd.f32 %v2927_v63, %v2644_v62 }
 0x98d   :  { %6170 = vtanh.f32 %v2928_v0 }
 0x997   :  { %v6171_v4 = vpop.eup %6170 }
 0x998   :  { %v2931_v12 = vmul.f32 %v6171_v4, %v2930_v2 }
 0x99a   :  { %v2934_v5 = vadd.f32 %v2933_v6, %v2931_v12 }
 0x99c   :  { %5517 = vmatmul.mubr.msk.f32.vlgmr.msra.gmra.mrb[40].mxu1 %vm425_vm2, %v2934_v5  ;;  %5528 = vmatmul.mubr.msk.f32.vlgmr.msra.gmra.mrb[38].mxu0 %vm425_vm2, %v2934_v5  ;;  %v3176_v46 = vrot.slane %v2934_v5, 4 }
 0x99d   :  { %5950 = vmatpush3.bf16.msra.mxu1 %v6877_v58  ;;  %5538 = vmatprep.mubr.msk.f32.mxu1 %vm6373_vm1, %v6374_v29 }
 0x99e   :  { %5951 = vmatprep.subr.bf16.mxu1 %v6372_v23  ;;  %5956 = vmatpush3.bf16.msra.mxu0 %v6843_v20 }
 0x99f   :  { %5957 = vmatprep.subr.bf16.mxu0 %v6372_v23  ;;  %5549 = vmatprep.mubr.msk.f32.mxu0 %vm6373_vm1, %v6374_v29 }
 0x9a1   :  { %5953 = vmatpush3.bf16.msra.mxu1 %v6886_v53 }
 0x9a2   :  { %5960 = vmatprep.subr.bf16.mxu1 %v6372_v23  ;;  %5959 = vmatpush3.bf16.msra.mxu0 %v6855_v30 }
 0x9a3   :  { %5966 = vmatprep.subr.bf16.mxu0 %v6372_v23 }
 0x9a4   :  { %5539 = vmatmul.mubr.msk.f32.vlgmr.msra.gmra.mrb[42].mxu1 %vm425_vm2, %v2934_v5 }
 0x9a5   :  { %5962 = vmatpush3.bf16.msra.mxu1 %v6847_v26  ;;  %5560 = vmatprep.mubr.msk.f32.mxu1 %vm6373_vm1, %v6374_v29 }
 0x9a6   :  { %5963 = vmatprep.subr.bf16.mxu1 %v6372_v23 }
 0x9a9   :  { %5965 = vmatpush3.bf16.msra.mxu1 %v6859_v31 }
 0x9aa   :  { %5972 = vmatprep.subr.bf16.mxu1 %v6372_v23 }
 0xa6f   :  { %v3004_v3 = vpop.f32.mrb[40].mxu1  ;;  %v3074_v7 = vpop.f32.mrb[38].mxu0 }
 0xa70   :  { %v3005_v9 = vadd.f32 %v6937_v37, %v3004_v3  ;;  %v3075_v28 = vadd.f32 %v6942_v39, %v3074_v7  ;;  %v5518_v32 = vpop.f32.mrb[41].mxu1  ;;  %v5529_v11 = vpop.f32.mrb[39].mxu0 }
 0xa72   :  { %v3149_v14 = vrot.slane %v3005_v9, 4  ;;  %v3159_v15 = vrot.slane %v3075_v28, 4 }
 0xa74   :  { %v3151_v16 = vadd.f32 %v3149_v14, %v2452_v41  ;;  %v3161_v45 = vadd.f32 %v3159_v15, %v2548_v18 }
 0xa76   :  { %v4836_v21 = vmul.f32 -1.442695, %v3151_v16  ;;  %v4837_v22 = vmul.f32 -1.442695, %v3161_v45 }
 0xa77   :  { %v3144_v47 = vpop.f32.mrb[42].mxu1 }
 0xa78   :  { %6172 = vpow2.f32 %v4836_v21  ;;  %v5540_v55 = vpop.f32.mrb[43].mxu1  ;;  %v3145_v43 = vadd.f32 %v6949_v54, %v3144_v47 }
 0xa79   :  { %6174 = vpow2.f32 %v4837_v22 }
 0xa7a   :  { %v3169_v24 = vrot.slane %v3145_v43, 4 }
 0xa82   :  { %v6173_v34 = vpop.eup %6172 }
 0xa83   :  { %v6175_v17 = vpop.eup %6174  ;;  %v3155_v56 = vadd.f32 1.0, %v6173_v34 }
 0xa84   :  { %v3165_v42 = vadd.f32 1.0, %v6175_v17 }
 0xa85   :  { %6176 = vrcp.f32 %v3155_v56 }
 0xa86   :  { %6178 = vrcp.f32 %v3165_v42 }
 0xa8f   :  { %v6177_v44 = vpop.eup %6176 }
 0xa90   :  { %v6179_v48 = vpop.eup %6178  ;;  %v3171_v41 = vmul.f32 %v6177_v44, %v3169_v24 }
 0xa91   :  { %v3178_v18 = vmul.f32 %v6179_v48, %v3176_v46  ;;  %v3174_v50 = vsub.f32 1.0, %v6179_v48 }
 0xa92   :  { %v3172_v49 = vadd.f32 %v3171_v41, %v2644_v62 }
 0xa94   :  { %6180 = vtanh.f32 %v3172_v49 }
 0xa9e   :  { %v6181_v57 = vpop.eup %6180 }
 0xa9f   :  { %v3175_v59 = vmul.f32 %v6181_v57, %v3174_v50 }
 0xaa1   :  { %v3179_v52 = vadd.f32 %v3178_v18, %v3175_v59 }
 0xaa3   :  { %v3181_v25 = vrot.slane %v3179_v52, 4 }
 0xaa5   :  { %5550 = vmatmul.mubr.msk.f32.vlgmr.msra.gmra.mrb[40].mxu0 %vm425_vm2, %v3181_v25  ;;  %5561 = vmatmul.mubr.msk.f32.vlgmr.msra.gmra.mrb[44].mxu1 %vm425_vm2, %v3181_v25 }
 0xaa6   :  { %5968 = vmatpush3.bf16.msra.mxu0 %v6877_v58  ;;  %5571 = vmatprep.mubr.msk.f32.mxu0 %vm6373_vm1, %v6374_v29 }
 0xaa7   :  { %5969 = vmatprep.subr.bf16.mxu0 %v6372_v23  ;;  %5974 = vmatpush3.bf16.msra.mxu1 %v6843_v20 }
 0xaa8   :  { %5975 = vmatprep.subr.bf16.mxu1 %v6372_v23  ;;  %5582 = vmatprep.mubr.msk.f32.mxu1 %vm6373_vm1, %v6374_v29 }
 0xaaa   :  { %5971 = vmatpush3.bf16.msra.mxu0 %v6886_v53 }
 0xaab   :  { %5978 = vmatprep.subr.bf16.mxu0 %v6372_v23  ;;  %5977 = vmatpush3.bf16.msra.mxu1 %v6855_v30 }
 0xaac   :  { %5984 = vmatprep.subr.bf16.mxu1 %v6372_v23 }
 0xaad   :  { %5572 = vmatmul.mubr.msk.f32.vlgmr.msra.gmra.mrb[42].mxu0 %vm425_vm2, %v3181_v25 }
 0xaae   :  { %5980 = vmatpush3.bf16.msra.mxu0 %v6847_v26  ;;  %5593 = vmatprep.mubr.msk.f32.mxu0 %vm6373_vm1, %v6374_v29 }
 0xaaf   :  { %5981 = vmatprep.subr.bf16.mxu0 %v6372_v23 }
 0xab2   :  { %5983 = vmatpush3.bf16.msra.mxu0 %v6859_v31 }
 0xab3   :  { %5990 = vmatprep.subr.bf16.mxu0 %v6372_v23 }
 0xb78   :  { %v3250_v36 = vpop.f32.mrb[40].mxu0  ;;  %v3320_v51 = vpop.f32.mrb[44].mxu1 }
 0xb79   :  { %v3251_v60 = vadd.f32 %v6937_v37, %v3250_v36  ;;  %v5551_v61 = vpop.f32.mrb[41].mxu0  ;;  %v5562_v62 = vpop.f32.mrb[45].mxu1  ;;  %v3321_v63 = vadd.f32 %v6942_v39, %v3320_v51 }
 0xb7b   :  { %v3394_v0 = vadd.f32 %v3251_v60, %v6910_v8  ;;  %v3401_v2 = vadd.f32 %v3321_v63, %v6922_v38 }
 0xb7d   :  { %v4841_v1 = vmul.f32 -1.442695, %v3394_v0  ;;  %v4842_v6 = vmul.f32 -1.442695, %v3401_v2 }
 0xb7f   :  { %6182 = vpow2.f32 %v4841_v1 }
 0xb80   :  { %v3390_v4 = vpop.f32.mrb[42].mxu0  ;;  %6184 = vpow2.f32 %v4842_v6 }
 0xb81   :  { %v5573_v12 = vpop.f32.mrb[43].mxu0  ;;  %v3391_v28 = vadd.f32 %v6949_v54, %v3390_v4 }
 0xb89   :  { %v6183_v5 = vpop.eup %6182 }
 0xb8a   :  { %v3398_v3 = vadd.f32 1.0, %v6183_v5  ;;  %v6185_v7 = vpop.eup %6184 }
 0xb8b   :  { %v3405_v9 = vadd.f32 1.0, %v6185_v7 }
 0xb8c   :  { %6186 = vrcp.f32 %v3398_v3 }
 0xb8d   :  { %6188 = vrcp.f32 %v3405_v9 }
 0xb96   :  { %v6187_v32 = vpop.eup %6186 }
 0xb97   :  { %v3408_v11 = vmul.f32 %v6187_v32, %v3391_v28  ;;  %v6189_v15 = vpop.eup %6188 }
 0xb98   :  { %v3411_v16 = vsub.f32 1.0, %v6189_v15  ;;  %v3414_v22 = vmul.f32 %v6189_v15, %v3181_v25 }
 0xb99   :  { %v3409_v14 = vadd.f32 %v3408_v11, %v6924_v19 }
 0xb9b   :  { %6190 = vtanh.f32 %v3409_v14 }
 0xba5   :  { %v6191_v45 = vpop.eup %6190 }
 0xba6   :  { %v3412_v21 = vmul.f32 %v6191_v45, %v3411_v16 }
 0xba8   :  { %v3415_v47 = vadd.f32 %v3414_v22, %v3412_v21 }
 0xbaa   :  { %5583 = vmatmul.mubr.msk.f32.vlgmr.msra.gmra.mrb[46].mxu1 %vm425_vm2, %v3415_v47  ;;  %5594 = vmatmul.mubr.msk.f32.vlgmr.msra.gmra.mrb[44].mxu0 %vm425_vm2, %v3415_v47  ;;  %v3657_v61 = vrot.slane %v3415_v47, 4 }
 0xbab   :  { %5986 = vmatpush3.bf16.msra.mxu1 %v6877_v58  ;;  %5604 = vmatprep.mubr.msk.f32.mxu1 %vm6373_vm1, %v6374_v29 }
 0xbac   :  { %5987 = vmatprep.subr.bf16.mxu1 %v6372_v23  ;;  %5992 = vmatpush3.bf16.msra.mxu0 %v6843_v20 }
 0xbad   :  { %5993 = vmatprep.subr.bf16.mxu0 %v6372_v23  ;;  %5615 = vmatprep.mubr.msk.f32.mxu0 %vm6373_vm1, %v6374_v29 }
 0xbaf   :  { %5989 = vmatpush3.bf16.msra.mxu1 %v6886_v53 }
 0xbb0   :  { %5996 = vmatprep.subr.bf16.mxu1 %v6372_v23  ;;  %5995 = vmatpush3.bf16.msra.mxu0 %v6855_v30 }
 0xbb1   :  { %6002 = vmatprep.subr.bf16.mxu0 %v6372_v23 }
 0xbb2   :  { %5605 = vmatmul.mubr.msk.f32.vlgmr.msra.gmra.mrb[48].mxu1 %vm425_vm2, %v3415_v47 }
 0xbb3   :  { %5998 = vmatpush3.bf16.msra.mxu1 %v6847_v26  ;;  %5626 = vmatprep.mubr.msk.f32.mxu1 %vm6373_vm1, %v6374_v29 }
 0xbb4   :  { %5999 = vmatprep.subr.bf16.mxu1 %v6372_v23 }
 0xbb7   :  { %6001 = vmatpush3.bf16.msra.mxu1 %v6859_v31 }
 0xbb8   :  { %6008 = vmatprep.subr.bf16.mxu1 %v6372_v23 }
 0xc7d   :  { %v3485_v55 = vpop.f32.mrb[46].mxu1  ;;  %v3555_v34 = vpop.f32.mrb[44].mxu0 }
 0xc7e   :  { %v3486_v17 = vadd.f32 %v6937_v37, %v3485_v55  ;;  %v3556_v56 = vadd.f32 %v6942_v39, %v3555_v34  ;;  %v5584_v42 = vpop.f32.mrb[47].mxu1  ;;  %v5595_v43 = vpop.f32.mrb[45].mxu0 }
 0xc80   :  { %v3630_v24 = vrot.slane %v3486_v17, 4  ;;  %v3640_v44 = vrot.slane %v3556_v56, 4 }
 0xc82   :  { %v3632_v46 = vadd.f32 %v3630_v24, %v6910_v8  ;;  %v3642_v48 = vadd.f32 %v3640_v44, %v6922_v38 }
 0xc84   :  { %v4846_v41 = vmul.f32 -1.442695, %v3632_v46  ;;  %v4847_v18 = vmul.f32 -1.442695, %v3642_v48 }
 0xc85   :  { %v3625_v49 = vpop.f32.mrb[48].mxu1 }
 0xc86   :  { %6192 = vpow2.f32 %v4846_v41  ;;  %v5606_v50 = vpop.f32.mrb[49].mxu1  ;;  %v3626_v36 = vadd.f32 %v6949_v54, %v3625_v49 }
 0xc87   :  { %6194 = vpow2.f32 %v4847_v18 }
 0xc88   :  { %v3650_v51 = vrot.slane %v3626_v36, 4 }
 0xc90   :  { %v6193_v57 = vpop.eup %6192 }
 0xc91   :  { %v6195_v59 = vpop.eup %6194  ;;  %v3636_v52 = vadd.f32 1.0, %v6193_v57 }
 0xc92   :  { %v3646_v25 = vadd.f32 1.0, %v6195_v59 }
 0xc93   :  { %6196 = vrcp.f32 %v3636_v52 }
 0xc94   :  { %6198 = vrcp.f32 %v3646_v25 }
 0xc9d   :  { %v6197_v60 = vpop.eup %6196 }
 0xc9e   :  { %v6199_v8 = vpop.eup %6198  ;;  %v3652_v62 = vmul.f32 %v6197_v60, %v3650_v51 }
 0xc9f   :  { %v3659_v38 = vmul.f32 %v6199_v8, %v3657_v61  ;;  %v3655_v0 = vsub.f32 1.0, %v6199_v8 }
 0xca0   :  { %v3653_v63 = vadd.f32 %v3652_v62, %v6924_v19 }
 0xca2   :  { %6200 = vtanh.f32 %v3653_v63 }
 0xcac   :  { %v6201_v1 = vpop.eup %6200 }
 0xcad   :  { %v3656_v2 = vmul.f32 %v6201_v1, %v3655_v0 }
 0xcaf   :  { %v3660_v4 = vadd.f32 %v3659_v38, %v3656_v2 }
 0xcb1   :  { %v3662_v12 = vrot.slane %v3660_v4, 4 }
 0xcb3   :  { %5616 = vmatmul.mubr.msk.f32.vlgmr.msra.gmra.mrb[46].mxu0 %vm425_vm2, %v3662_v12  ;;  %5627 = vmatmul.mubr.msk.f32.vlgmr.msra.gmra.mrb[50].mxu1 %vm425_vm2, %v3662_v12 }
 0xcb4   :  { %6004 = vmatpush3.bf16.msra.mxu0 %v6877_v58  ;;  %5637 = vmatprep.mubr.msk.f32.mxu0 %vm6373_vm1, %v6374_v29 }
 0xcb5   :  { %6005 = vmatprep.subr.bf16.mxu0 %v6372_v23  ;;  %6010 = vmatpush3.bf16.msra.mxu1 %v6843_v20 }
 0xcb6   :  { %6011 = vmatprep.subr.bf16.mxu1 %v6372_v23  ;;  %5648 = vmatprep.mubr.msk.f32.mxu1 %vm6373_vm1, %v6374_v29 }
 0xcb8   :  { %6007 = vmatpush3.bf16.msra.mxu0 %v6886_v53 }
 0xcb9   :  { %6014 = vmatprep.subr.bf16.mxu0 %v6372_v23  ;;  %6013 = vmatpush3.bf16.msra.mxu1 %v6855_v30 }
 0xcba   :  { %6020 = vmatprep.subr.bf16.mxu1 %v6372_v23 }
 0xcbb   :  { %5638 = vmatmul.mubr.msk.f32.vlgmr.msra.gmra.mrb[48].mxu0 %vm425_vm2, %v3662_v12 }
 0xcbc   :  { %6016 = vmatpush3.bf16.msra.mxu0 %v6847_v26  ;;  %5659 = vmatprep.mubr.msk.f32.mxu0 %vm6373_vm1, %v6374_v29 }
 0xcbd   :  { %6017 = vmatprep.subr.bf16.mxu0 %v6372_v23 }
 0xcc0   :  { %6019 = vmatpush3.bf16.msra.mxu0 %v6859_v31 }
 0xcc1   :  { %6026 = vmatprep.subr.bf16.mxu0 %v6372_v23 }
 0xd86   :  { %v3731_v19 = vpop.f32.mrb[46].mxu0  ;;  %v3801_v6 = vpop.f32.mrb[50].mxu1 }
 0xd87   :  { %v3732_v5 = vadd.f32 %v6937_v37, %v3731_v19  ;;  %v5617_v3 = vpop.f32.mrb[47].mxu0  ;;  %v5628_v7 = vpop.f32.mrb[51].mxu1  ;;  %v3802_v9 = vadd.f32 %v6942_v39, %v3801_v6 }
 0xd89   :  { %v3875_v28 = vadd.f32 %v3732_v5, %v6917_v13  ;;  %v3882_v11 = vadd.f32 %v3802_v9, %v6928_v40 }
 0xd8b   :  { %v4851_v32 = vmul.f32 -1.442695, %v3875_v28  ;;  %v4852_v16 = vmul.f32 -1.442695, %v3882_v11 }
 0xd8d   :  { %6202 = vpow2.f32 %v4851_v32 }
 0xd8e   :  { %v3871_v14 = vpop.f32.mrb[48].mxu0  ;;  %6204 = vpow2.f32 %v4852_v16 }
 0xd8f   :  { %v5639_v15 = vpop.f32.mrb[49].mxu0  ;;  %v3872_v55 = vadd.f32 %v6949_v54, %v3871_v14 }
 0xd97   :  { %v6203_v45 = vpop.eup %6202 }
 0xd98   :  { %v3879_v21 = vadd.f32 1.0, %v6203_v45  ;;  %v6205_v22 = vpop.eup %6204 }
 0xd99   :  { %v3886_v47 = vadd.f32 1.0, %v6205_v22 }
 0xd9a   :  { %6206 = vrcp.f32 %v3879_v21 }
 0xd9b   :  { %6208 = vrcp.f32 %v3886_v47 }
 0xda4   :  { %v6207_v34 = vpop.eup %6206 }
 0xda5   :  { %v3889_v17 = vmul.f32 %v6207_v34, %v3872_v55  ;;  %v6209_v42 = vpop.eup %6208 }
 0xda6   :  { %v3892_v43 = vsub.f32 1.0, %v6209_v42  ;;  %v3895_v46 = vmul.f32 %v6209_v42, %v3662_v12 }
 0xda7   :  { %v3890_v56 = vadd.f32 %v3889_v17, %v6932_v35 }
 0xda9   :  { %6210 = vtanh.f32 %v3890_v56 }
 0xdb3   :  { %v6211_v24 = vpop.eup %6210 }
 0xdb4   :  { %v3893_v44 = vmul.f32 %v6211_v24, %v3892_v43 }
 0xdb6   :  { %v3896_v48 = vadd.f32 %v3895_v46, %v3893_v44 }
 0xdb8   :  { %5649 = vmatmul.mubr.msk.f32.vlgmr.msra.gmra.mrb[52].mxu1 %vm425_vm2, %v3896_v48  ;;  %5660 = vmatmul.mubr.msk.f32.vlgmr.msra.gmra.mrb[50].mxu0 %vm425_vm2, %v3896_v48  ;;  %v4138_v19 = vrot.slane %v3896_v48, 4 }
 0xdb9   :  { %6022 = vmatpush3.bf16.msra.mxu1 %v6877_v58  ;;  %5670 = vmatprep.mubr.msk.f32.mxu1 %vm6373_vm1, %v6374_v29 }
 0xdba   :  { %6023 = vmatprep.subr.bf16.mxu1 %v6372_v23  ;;  %6028 = vmatpush3.bf16.msra.mxu0 %v6843_v20 }
 0xdbb   :  { %6029 = vmatprep.subr.bf16.mxu0 %v6372_v23  ;;  %5681 = vmatprep.mubr.msk.f32.mxu0 %vm6373_vm1, %v6374_v29 }
 0xdbd   :  { %6025 = vmatpush3.bf16.msra.mxu1 %v6886_v53 }
 0xdbe   :  { %6032 = vmatprep.subr.bf16.mxu1 %v6372_v23  ;;  %6031 = vmatpush3.bf16.msra.mxu0 %v6855_v30 }
 0xdbf   :  { %6038 = vmatprep.subr.bf16.mxu0 %v6372_v23 }
 0xdc0   :  { %5671 = vmatmul.mubr.msk.f32.vlgmr.msra.gmra.mrb[54].mxu1 %vm425_vm2, %v3896_v48 }
 0xdc1   :  { %6034 = vmatpush3.bf16.msra.mxu1 %v6847_v26  ;;  %5692 = vmatprep.mubr.msk.f32.mxu1 %vm6373_vm1, %v6374_v29 }
 0xdc2   :  { %6035 = vmatprep.subr.bf16.mxu1 %v6372_v23 }
 0xdc5   :  { %6037 = vmatpush3.bf16.msra.mxu1 %v6859_v31 }
 0xdc6   :  { %6044 = vmatprep.subr.bf16.mxu1 %v6372_v23 }
 0xe8b   :  { %v3966_v41 = vpop.f32.mrb[52].mxu1  ;;  %v4036_v18 = vpop.f32.mrb[50].mxu0 }
 0xe8c   :  { %v3967_v49 = vadd.f32 %v6937_v37, %v3966_v41  ;;  %v4037_v50 = vadd.f32 %v6942_v39, %v4036_v18  ;;  %v5650_v57 = vpop.f32.mrb[53].mxu1  ;;  %v5661_v59 = vpop.f32.mrb[51].mxu0 }
 0xe8d   :  { %v4625_v57 = vld [vmem:[%s7170_s10 + $0x10] sm:$0xff] }
 0xe8e   :  { %v4111_v52 = vrot.slane %v3967_v49, 4  ;;  %v4121_v25 = vrot.slane %v4037_v50, 4  ;;  %v4623_v50 = vld [vmem:[%s7170_s10] sm:$0xff] }
 0xe90   :  { %v4113_v36 = vadd.f32 %v4111_v52, %v6917_v13  ;;  %v4123_v51 = vadd.f32 %v4121_v25, %v6928_v40 }
 0xe92   :  { %v4856_v60 = vmul.f32 -1.442695, %v4113_v36  ;;  %v4857_v61 = vmul.f32 -1.442695, %v4123_v51 }
 0xe93   :  { %v4106_v8 = vpop.f32.mrb[54].mxu1 }
 0xe94   :  { %6212 = vpow2.f32 %v4856_v60  ;;  %v5672_v62 = vpop.f32.mrb[55].mxu1  ;;  %v4107_v2 = vadd.f32 %v6949_v54, %v4106_v8 }
 0xe95   :  { %6214 = vpow2.f32 %v4857_v61 }
 0xe96   :  { %v4131_v4 = vrot.slane %v4107_v2, 4 }
 0xe9e   :  { %v6213_v38 = vpop.eup %6212 }
 0xe9f   :  { %v6215_v63 = vpop.eup %6214  ;;  %v4117_v0 = vadd.f32 1.0, %v6213_v38 }
 0xea0   :  { %v4127_v1 = vadd.f32 1.0, %v6215_v63 }
 0xea1   :  { %6216 = vrcp.f32 %v4117_v0 }
 0xea2   :  { %6218 = vrcp.f32 %v4127_v1 }
 0xeab   :  { %v6217_v12 = vpop.eup %6216 }
 0xeac   :  { %v6219_v13 = vpop.eup %6218  ;;  %v4133_v6 = vmul.f32 %v6217_v12, %v4131_v4 }
 0xead   :  { %v4140_v40 = vmul.f32 %v6219_v13, %v4138_v19  ;;  %v4136_v3 = vsub.f32 1.0, %v6219_v13 }
 0xeae   :  { %v4134_v5 = vadd.f32 %v4133_v6, %v6932_v35 }
 0xeb0   :  { %6220 = vtanh.f32 %v4134_v5 }
 0xeba   :  { %v6221_v7 = vpop.eup %6220 }
 0xebb   :  { %v4137_v9 = vmul.f32 %v6221_v7, %v4136_v3 }
 0xebd   :  { %v4141_v28 = vadd.f32 %v4140_v40, %v4137_v9 }
 0xebf   :  { %v4143_v32 = vrot.slane %v4141_v28, 4 }
 0xec1   :  { %5682 = vmatmul.mubr.msk.f32.vlgmr.msra.gmra.mrb[52].mxu0 %vm425_vm2, %v4143_v32  ;;  %5693 = vmatmul.mubr.msk.f32.vlgmr.msra.gmra.mrb[56].mxu1 %vm425_vm2, %v4143_v32 }
 0xec2   :  { %6040 = vmatpush3.bf16.msra.mxu0 %v6877_v58  ;;  %5703 = vmatprep.mubr.msk.f32.mxu0 %vm6373_vm1, %v6374_v29 }
 0xec3   :  { %6041 = vmatprep.subr.bf16.mxu0 %v6372_v23  ;;  %6046 = vmatpush3.bf16.msra.mxu1 %v6843_v20 }
 0xec4   :  { %6047 = vmatprep.subr.bf16.mxu1 %v6372_v23  ;;  %5714 = vmatprep.mubr.msk.f32.mxu1 %vm6373_vm1, %v6374_v29 }
 0xec6   :  { %6043 = vmatpush3.bf16.msra.mxu0 %v6886_v53 }
 0xec7   :  { %6050 = vmatprep.subr.bf16.mxu0 %v6372_v23  ;;  %6049 = vmatpush3.bf16.msra.mxu1 %v6855_v30 }
 0xec8   :  { %6056 = vmatprep.subr.bf16.mxu1 %v6372_v23 }
 0xec9   :  { %5704 = vmatmul.mubr.msk.f32.vlgmr.msra.gmra.mrb[54].mxu0 %vm425_vm2, %v4143_v32 }
 0xeca   :  { %6052 = vmatpush3.bf16.msra.mxu0 %v6847_v26  ;;  %5725 = vmatprep.mubr.msk.f32.mxu0 %vm6373_vm1, %v6374_v29 }
 0xecb   :  { %6053 = vmatprep.subr.bf16.mxu0 %v6372_v23 }
 0xece   :  { %6055 = vmatpush3.bf16.msra.mxu0 %v6859_v31 }
 0xecf   :  { %6062 = vmatprep.subr.bf16.mxu0 %v6372_v23 }
 0xf94   :  { %v4212_v20 = vpop.f32.mrb[52].mxu0  ;;  %v4282_v35 = vpop.f32.mrb[56].mxu1 }
 0xf95   :  { %v4213_v11 = vadd.f32 %v6937_v37, %v4212_v20  ;;  %v5683_v30 = vpop.f32.mrb[53].mxu0  ;;  %v5694_v14 = vpop.f32.mrb[57].mxu1  ;;  %v4283_v15 = vadd.f32 %v6942_v39, %v4282_v35 }
 0xf97   :  { %v4356_v16 = vadd.f32 %v4213_v11, %v6915_v10  ;;  %v4363_v45 = vadd.f32 %v4283_v15, %v6926_v27 }
 0xf99   :  { %v4861_v26 = vmul.f32 -1.442695, %v4356_v16  ;;  %v4862_v47 = vmul.f32 -1.442695, %v4363_v45 }
 0xf9b   :  { %6222 = vpow2.f32 %v4861_v26 }
 0xf9c   :  { %v4352_v21 = vpop.f32.mrb[54].mxu0  ;;  %6224 = vpow2.f32 %v4862_v47 }
 0xf9d   :  { %v5705_v22 = vpop.f32.mrb[55].mxu0  ;;  %v4353_v56 = vadd.f32 %v6949_v54, %v4352_v21 }
 0xfa5   :  { %v6223_v31 = vpop.eup %6222 }
 0xfa6   :  { %v4360_v55 = vadd.f32 1.0, %v6223_v31  ;;  %v6225_v34 = vpop.eup %6224 }
 0xfa7   :  { %v4367_v17 = vadd.f32 1.0, %v6225_v34 }
 0xfa8   :  { %6226 = vrcp.f32 %v4360_v55 }
 0xfa9   :  { %6228 = vrcp.f32 %v4367_v17 }
 0xfb2   :  { %v6227_v42 = vpop.eup %6226 }
 0xfb3   :  { %v4370_v43 = vmul.f32 %v6227_v42, %v4353_v56  ;;  %v6229_v44 = vpop.eup %6228 }
 0xfb4   :  { %v4373_v46 = vsub.f32 1.0, %v6229_v44  ;;  %v4376_v18 = vmul.f32 %v6229_v44, %v4143_v32 }
 0xfb5   :  { %v4371_v24 = vadd.f32 %v4370_v43, %v6930_v33 }
 0xfb7   :  { %6230 = vtanh.f32 %v4371_v24 }
 0xfc1   :  { %v6231_v48 = vpop.eup %6230 }
 0xfc2   :  { %v4374_v41 = vmul.f32 %v6231_v48, %v4373_v46 }
 0xfc4   :  { %v4377_v49 = vadd.f32 %v4376_v18, %v4374_v41 }
 0xfc6   :  { %5715 = vmatmul.mubr.msk.f32.vlgmr.msra.gmra.mrb[58].mxu1 %vm425_vm2, %v4377_v49  ;;  %5726 = vmatmul.mubr.msk.f32.vlgmr.msra.gmra.mrb[56].mxu0 %vm425_vm2, %v4377_v49  ;;  %v4619_v40 = vrot.slane %v4377_v49, 4 }
 0xfc7   :  { %6058 = vmatpush3.bf16.msra.mxu1 %v6877_v58  ;;  %5736 = vmatprep.mubr.msk.f32.mxu1 %vm6373_vm1, %v6374_v29  ;;  %v4624_v58 = vld [vmem:[%s7170_s10 + $0x8] sm:$0xff] }
 0xfc8   :  { %6059 = vmatprep.subr.bf16.mxu1 %v6372_v23  ;;  %5747 = vmatprep.mubr.msk.f32.mxu0 %vm6373_vm1, %v6374_v29  ;;  %v6063_v59 = vpack.c.bf16 %v4624_v58, %v4623_v50  ;;  %v4626_v29 = vld [vmem:[%s7170_s10 + $0x18] sm:$0xff] }
 0xfca   :  { %6064 = vmatpush3.bf16.msra.mxu0 %v6063_v59 }
 0xfcb   :  { %6061 = vmatpush3.bf16.msra.mxu1 %v6886_v53  ;;  %v6066_v53 = vpack.c.bf16 %v4626_v29, %v4625_v57  ;;  %6065 = vmatprep.subr.bf16.mxu0 %v6372_v23 }
 0xfce   :  { %5737 = vmatmul.mubr.msk.f32.vlgmr.msra.gmra.mrb[60].mxu1 %vm425_vm2, %v4377_v49  ;;  %6067 = vmatpush3.bf16.msra.mxu0 %v6066_v53 }
0x1099   :  { %v4447_v52 = vpop.f32.mrb[58].mxu1  ;;  %v4517_v25 = vpop.f32.mrb[56].mxu0 }
0x109a   :  { %v4448_v36 = vadd.f32 %v6937_v37, %v4447_v52  ;;  %v4518_v51 = vadd.f32 %v6942_v39, %v4517_v25  ;;  %v5716_v60 = vpop.f32.mrb[59].mxu1  ;;  %v5727_v61 = vpop.f32.mrb[57].mxu0 }
0x109c   :  { %v4592_v8 = vrot.slane %v4448_v36, 4  ;;  %v4602_v62 = vrot.slane %v4518_v51, 4 }
0x109e   :  { %v4594_v38 = vadd.f32 %v4592_v8, %v6915_v10  ;;  %v4604_v63 = vadd.f32 %v4602_v62, %v6926_v27 }
0x10a0   :  { %v4866_v0 = vmul.f32 -1.442695, %v4594_v38  ;;  %v4867_v1 = vmul.f32 -1.442695, %v4604_v63 }
0x10a1   :  { %v4587_v2 = vpop.f32.mrb[60].mxu1 }
0x10a2   :  { %6232 = vpow2.f32 %v4866_v0  ;;  %v5738_v23 = vpop.f32.mrb[61].mxu1  ;;  %v4588_v39 = vadd.f32 %v6949_v54, %v4587_v2  ;;  %v4868_v54 = vld [vmem:[%s7171_s11] ss:$0 sm:$0xff]  ;;  %s4728_s11 = sshll.u32 %s6375_s6, 4  ;;  %s4729_s11 = int_to_ptr.vmem [resolvable:$true] %s4728_s11 }
0x10a3   :  { %6234 = vpow2.f32 %v4867_v1  ;;  %s6334_s14 = scalar_lea.vmem %s4729_s11, 64  ;;  %p6339_p5 = scmp.lt.s32.totalorder %s4729_s11, %s4729_s11 }
0x10a4   :  { %v4612_v13 = vrot.slane %v4588_v39, 4  ;;  %p6335_p4 = scmp.ne.s32.totalorder %s4729_s11, %s6334_s14  ;;  %p6340_p6 = scmp.lt.s32.totalorder %s6334_s14, %s6334_s14 }
0x10a6   :  { %p6341_p7 = por %p6340_p6, %p6339_p5 }
0x10a8   :  { %p6342_p8 = pnand %p6341_p7, %p6335_p4 }
0x10ac   :  { %v6233_v4 = vpop.eup %6232 }
0x10ad   :  { %v6235_v12 = vpop.eup %6234  ;;  %v4598_v19 = vadd.f32 1.0, %v6233_v4 }
0x10ae   :  { %v4608_v37 = vadd.f32 1.0, %v6235_v12 }
0x10af   :  { %6236 = vrcp.f32 %v4598_v19 }
0x10b0   :  { %6238 = vrcp.f32 %v4608_v37 }
0x10b9   :  { %v6237_v6 = vpop.eup %6236 }
0x10ba   :  { %v6239_v10 = vpop.eup %6238  ;;  %v4614_v5 = vmul.f32 %v6237_v6, %v4612_v13 }
0x10bb   :  { %v4621_v27 = vmul.f32 %v6239_v10, %v4619_v40  ;;  %v4617_v7 = vsub.f32 1.0, %v6239_v10 }
0x10bc   :  { %v4615_v3 = vadd.f32 %v4614_v5, %v6930_v33 }
0x10be   :  { %6240 = vtanh.f32 %v4615_v3 }
0x10c8   :  { %v6241_v9 = vpop.eup %6240 }
0x10c9   :  { %v4618_v28 = vmul.f32 %v6241_v9, %v4617_v7 }
0x10cb   :  { %v4622_v32 = vadd.f32 %v4621_v27, %v4618_v28 }
0x10cd   :  { %v4635_v20 = vrot.slane %v4622_v32, 4 }
0x10cf   :  { %5748 = vmatmul.mubr.msk.f32.vlgmr.msra.gmra.mrb[58].mxu0 %vm425_vm2, %v4635_v20 }
0x11a2   :  { %v4704_v35 = vpop.f32.mrb[58].mxu0 }
0x11a3   :  { %v4705_v11 = vadd.f32 %v4868_v54, %v4704_v35  ;;  %v5749_v30 = vpop.f32.mrb[59].mxu0 }
0x11a5   :  { %v4709_v14 = vsel %vm4708_vm3, %v4705_v11, -inf }
0x11a6   :  { %4710 = vmax.xlane.f32.xlu0 %v4709_v14 }
0x1233   :  { %v4711_v33 = vpop.xlane.xlu0 %4710 }
0x1234   :  { %v4712_v15 = vsub.f32 %v4705_v11, %v4711_v33 }
0x1236   :  { %v4713_v16 = vmul.f32 1.442695, %v4712_v15 }
0x1238   :  { %6242 = vpow2.f32 %v4713_v16 }
0x1242   :  { %v6243_v26 = vpop.eup %6242 }
0x1243   :  { %v4715_v45 = vsel %vm4708_vm3, %v6243_v26, 0.0 }
0x1244   :  { %4716 = vadd.xlane.f32.xlu0 %v4715_v45 }
0x12d1   :  { %v4717_v21 = vpop.xlane.xlu0 %4716 }
0x12d2   :  { %6244 = vlog2.f32 %v4717_v21 }
0x12dc   :  { %v6245_v22 = vpop.eup %6244 }
0x12dd   :  { %v4719_v47 = vmul.f32 0.6931472, %v6245_v22 }
0x12df   :  { %v4720_v31 = vsub.f32 %v4712_v15, %v4719_v47 }
0x12e1   :  { %4721 = vst.msk [vmem:[#allocation10] sm:$0xf] %vm4708_vm3, %v4720_v31 }
0x12e2   :  { %6345 = shalt.err (!%p6342_p8)
}
0x12e3   :  { %s6346_s2 = scalar_lea.hbm %s7172_s12, 64 }
0x12e4   :  { %p6347_p9 = scmp.ne.s32.totalorder %s7172_s12, %s6346_s2  ;;  %p6350_p10 = scmp.lt.u32.totalorder %s6346_s2, %s7172_s12 }
0x12e6   :  { %p6352_p11 = pnand %p6350_p10, %p6347_p9 }
0x12e8   :  { %6355 = shalt.err (!%p6352_p11)
}
0x12e9   :  { %4731 = dma.vmem_to_hbm [thread:$0]  %s4729_s11, 64, %s7172_s12, [#allocation4]  }
0x12ea   :  { %6362 = dma.done.wait [#allocation4], 64  }
0x12eb   :  { %6363 = vsyncadd [#allocation4], 4294967232 }
0x12ec   :  { %4735 = vsyncpa [#allocation3], 1 }
0x12ed   :  { %4736 = vsyncpa [#allocation6], 1 }
0x12ee   :  { %4737 = vsyncpa [#allocation9], 1 }
0x12ef   :  { %4738 = vsyncpa [#allocation4], 1 }

</bundles_post_ra>
